<compile_context>
chip_gen: v6e
topology: v6e:2x2x1
jax: 0.10.0
libtpu: 0.0.40
codegen_flags: <defaults>
</compile_context>

<pallas_src>
import functools
import math

import jax
import jax.numpy as jnp
from jax.experimental import pallas as pl
from jax.experimental.pallas import tpu as pltpu


_SQRT_2_OVER_PI = 0.7978845608028654
_LN_EPS = 1e-5  # torch.nn.LayerNorm default


def _gelu_tanh(x):
    # TODO(synk): PyTorch nn.GELU() defaults to erf-exact; tanh approximation is
    # used here (guaranteed Mosaic lowering); max abs deviation ~1e-3.
    return 0.5 * x * (1.0 + jnp.tanh(_SQRT_2_OVER_PI * (x + 0.044715 * x * x * x)))


def _layer_norm(x, g, b, eps):
    mu = jnp.mean(x, axis=-1, keepdims=True)
    xc = x - mu
    var = jnp.mean(xc * xc, axis=-1, keepdims=True)
    return xc * jax.lax.rsqrt(var + eps) * g + b


# --------------------------------------------------------------------------- #
# Kernels
# --------------------------------------------------------------------------- #
def _blocks_kernel(x_ref, ln1g_ref, ln1b_ref, wqkv_ref, wproj_ref, bproj_ref,
                   ln2g_ref, ln2b_ref, wfc1_ref, bfc1_ref, wfc2_ref, bfc2_ref,
                   o_ref, *, num_heads, eps, compute_dtype):
    """One transformer Block per (batch_tile, depth) grid step.

    The running residual activation lives in the VMEM-resident output block
    across the inner depth axis (same output block index for every d), seeded
    from the input tile at depth step 0.
    """
    d_step = pl.program_id(1)

    @pl.when(d_step == 0)
    def _():
        o_ref[...] = x_ref[...]

    bt, n, c = o_ref.shape
    hd = wproj_ref.shape[2]               # head_dim
    d_all = num_heads * hd                # all_head_dim
    m = bt * n
    cd = compute_dtype

    # Fold the batch tile into the matmul M dimension.
    x = o_ref[...].astype(jnp.float32).reshape(m, c)

    # ---- LayerNorm 1 + fused qkv projection (softmax scale pre-folded into the
    #      q columns of the (C, 3D) weight slab at wrapper time) ----------------
    xn = _layer_norm(x, ln1g_ref[0], ln1b_ref[0], eps)
    qkv = jnp.dot(xn.astype(cd), wqkv_ref[0],
                  preferred_element_type=jnp.float32)                 # (M, 3D) f32

    q = qkv[:, 0 * d_all:1 * d_all].reshape(bt, n, d_all)
    k = qkv[:, 1 * d_all:2 * d_all].reshape(bt, n, d_all)
    v = qkv[:, 2 * d_all:3 * d_all].reshape(bt, n, d_all)

    # ---- per-head attention; output projection accumulated inside the loop
    #      (w_proj pre-reshaped (H, hd, C)) -> no scratch, no masked lane stores.
    # TODO(synk): for very long sequences convert this static loop to a
    # lax.fori_loop with head-major VMEM staging to bound (bt, N, N) live ranges.
    y = jnp.zeros((m, c), jnp.float32)
    for h in range(num_heads):
        lo = h * hd
        qh = q[:, :, lo:lo + hd]
        kh = k[:, :, lo:lo + hd]
        vh = v[:, :, lo:lo + hd]
        s = jnp.einsum('bqd,bkd->bqk', qh.astype(cd), kh.astype(cd),
                       preferred_element_type=jnp.float32)            # (bt, n, n)
        mx = jnp.max(s, axis=-1, keepdims=True)
        e = jnp.exp(s - mx)
        p = e * pl.reciprocal(jnp.sum(e, axis=-1, keepdims=True), approx=True)
        ah = jnp.einsum('bqk,bkd->bqd', p.astype(cd), vh.astype(cd),
                        preferred_element_type=jnp.float32)           # (bt, n, hd)
        y = y + jnp.dot(ah.reshape(m, hd).astype(cd), wproj_ref[0, h],
                        preferred_element_type=jnp.float32)           # (M, C)

    h1 = x + y + bproj_ref[0]                                         # residual 1

    # ---- LayerNorm 2 + MLP + residual ----------------------------------------
    hn = _layer_norm(h1, ln2g_ref[0], ln2b_ref[0], eps)
    z = jnp.dot(hn.astype(cd), wfc1_ref[0],
                preferred_element_type=jnp.float32) + bfc1_ref[0]
    z = _gelu_tanh(z)
    z = jnp.dot(z.astype(cd), wfc2_ref[0],
                preferred_element_type=jnp.float32) + bfc2_ref[0]
    out = h1 + z                                                      # residual 2

    o_ref[...] = out.reshape(bt, n, c).astype(o_ref.dtype)


def _head_kernel(x_ref, lng_ref, lnb_ref, wh_ref, bh_ref, o_ref, *,
                 eps, compute_dtype):
    bt, n, c = x_ref.shape
    x = x_ref[...].astype(jnp.float32).reshape(bt * n, c)
    xn = _layer_norm(x, lng_ref[...], lnb_ref[...], eps)
    y = jnp.dot(xn.astype(compute_dtype), wh_ref[...],
                preferred_element_type=jnp.float32) + bh_ref[...]
    o_ref[...] = y.reshape(bt, n, y.shape[-1]).astype(o_ref.dtype)


# --------------------------------------------------------------------------- #
# VMEM budgeting / tiling heuristics
# --------------------------------------------------------------------------- #
def _vmem_capacity_bytes():
    try:
        info = pltpu.get_tpu_info()
        cap = getattr(info, "vmem_capacity_bytes", None)
        if cap:
            return int(cap)
    except Exception:
        pass
    return 64 * 1024 * 1024  # conservative fallback (v7x per-TensorCore VMEM)


def _blocks_vmem_estimate(block_b, N, C, D, hidden, num_heads, w_itemsize):
    f32 = 4
    m = block_b * N
    io_tiles = 2 * 2 * block_b * N * C * f32                    # x + out, 2 buffers
    per_layer_w = (C * 3 * D + D * C + C * hidden + hidden * C) * w_itemsize
    per_layer_p = (6 * C + hidden) * f32                        # LN/bias rows
    weights = 2 * (per_layer_w + per_layer_p)                   # double-buffered
    inter = (m * 3 * D + 3 * m * D + 2 * block_b * N * N
             + 4 * m * C + 2 * m * hidden) * f32                # kernel intermediates
    return io_tiles + weights + inter


def _choose_block_b(B, N, C, D, hidden, num_heads, w_itemsize, budget,
                    target_rows=512):
    bb = max(1, min(B, -(-target_rows // max(N, 1))))           # ceil(target/N)
    while B % bb:
        bb -= 1
    # keep >= 2 grid steps along the batch axis (v7x has 2 TensorCores/chip)
    if B >= 2 and B // bb < 2:
        bb = max(1, B // 2)
        while B % bb:
            bb -= 1
    # shrink against the generation-aware VMEM budget
    while bb > 1 and _blocks_vmem_estimate(bb, N, C, D, hidden, num_heads,
                                           w_itemsize) > budget:
        bb -= 1
        while B % bb:
            bb -= 1
    return bb


def _layer_spec(shape):
    """BlockSpec for a depth-stacked per-layer parameter of trailing `shape`."""
    zeros = (0,) * len(shape)
    return pl.BlockSpec((1,) + tuple(shape), lambda b, d: (d,) + zeros)


# --------------------------------------------------------------------------- #
# Wrappers
# --------------------------------------------------------------------------- #
def _run_head(x, head, *, block_b, eps, compute_dtype, budget):
    B, N, C = x.shape
    out_dim = head['w_head'].shape[0]
    w_head_t = head['w_head'].astype(jnp.float32).T.astype(compute_dtype)  # (C, out)
    kernel = functools.partial(_head_kernel, eps=eps, compute_dtype=compute_dtype)

    est = 4 * (2 * block_b * N * (C + out_dim) * 4 + 2 * C * out_dim * 2)
    vmem_limit = int(min(budget, max(32 * 1024 * 1024, est)))

    return pl.pallas_call(
        kernel,
        out_shape=jax.ShapeDtypeStruct((B, N, out_dim), x.dtype),
        grid_spec=pltpu.PrefetchScalarGridSpec(
            num_scalar_prefetch=0,
            grid=(B // block_b,),
            in_specs=[
                pl.BlockSpec((block_b, N, C), lambda b: (b, 0, 0)),
                pl.BlockSpec((1, C), lambda b: (0, 0)),
                pl.BlockSpec((1, C), lambda b: (0, 0)),
                pl.BlockSpec((C, out_dim), lambda b: (0, 0)),
                pl.BlockSpec((1, out_dim), lambda b: (0, 0)),
            ],
            out_specs=pl.BlockSpec((block_b, N, out_dim), lambda b: (b, 0, 0)),
        ),
        compiler_params=pltpu.CompilerParams(
            dimension_semantics=("parallel",),
            vmem_limit_bytes=vmem_limit),
    )(x,
      head['ln_g'].reshape(1, C).astype(jnp.float32),
      head['ln_b'].reshape(1, C).astype(jnp.float32),
      w_head_t,
      head['b_head'].reshape(1, out_dim).astype(jnp.float32))


def decoder_forward_pallas(x, blocks, head, *, num_heads, scale,
                           eps=_LN_EPS, block_b=None,
                           compute_dtype=jnp.bfloat16):
    """x: (B, N, C); blocks: list of per-Block param dicts (PyTorch layouts);
    head: {'ln_g','ln_b','w_head','b_head'}."""
    B, N, C = x.shape
    depth = len(blocks)
    D = blocks[0]['w_proj'].shape[1]           # all_head_dim
    hidden = blocks[0]['w_fc1'].shape[0]
    hd = D // num_heads
    w_itemsize = jnp.dtype(compute_dtype).itemsize

    budget = int(0.85 * _vmem_capacity_bytes())
    if block_b is None:
        block_b = _choose_block_b(B, N, C, D, hidden, num_heads, w_itemsize, budget)

    # ---- wrapper-side (free) parameter prep ----------------------------------
    # fold softmax scale into the q columns of the fused qkv slab, pre-transpose
    # every weight, reshape w_proj head-major, stack along depth, cast the big
    # matmul weights to the MXU compute dtype (LN params / biases stay f32).
    col_scale = jnp.concatenate([jnp.full((D,), scale, jnp.float32),
                                 jnp.ones((2 * D,), jnp.float32)])

    def stack(fn):
        return jnp.stack([fn(p) for p in blocks])

    w_qkv = stack(lambda p: (p['w_qkv'].astype(jnp.float32).T
                             * col_scale[None, :]).astype(compute_dtype))      # (L,C,3D)
    w_proj = stack(lambda p: p['w_proj'].astype(jnp.float32).T
                   .reshape(num_heads, hd, C).astype(compute_dtype))           # (L,H,hd,C)
    w_fc1 = stack(lambda p: p['w_fc1'].astype(jnp.float32).T
                  .astype(compute_dtype))                                      # (L,C,hid)
    w_fc2 = stack(lambda p: p['w_fc2'].astype(jnp.float32).T
                  .astype(compute_dtype))                                      # (L,hid,C)

    ln1g = stack(lambda p: p['ln1_g'].reshape(1, C).astype(jnp.float32))
    ln1b = stack(lambda p: p['ln1_b'].reshape(1, C).astype(jnp.float32))
    ln2g = stack(lambda p: p['ln2_g'].reshape(1, C).astype(jnp.float32))
    ln2b = stack(lambda p: p['ln2_b'].reshape(1, C).astype(jnp.float32))
    bproj = stack(lambda p: p['b_proj'].reshape(1, C).astype(jnp.float32))
    bfc1 = stack(lambda p: p['b_fc1'].reshape(1, hidden).astype(jnp.float32))
    bfc2 = stack(lambda p: p['b_fc2'].reshape(1, C).astype(jnp.float32))

    est = _blocks_vmem_estimate(block_b, N, C, D, hidden, num_heads, w_itemsize)
    vmem_limit = int(min(budget, max(32 * 1024 * 1024, int(1.5 * est))))

    kernel = functools.partial(_blocks_kernel, num_heads=num_heads, eps=eps,
                               compute_dtype=compute_dtype)

    x = pl.pallas_call(
        kernel,
        out_shape=jax.ShapeDtypeStruct((B, N, C), x.dtype),
        grid_spec=pltpu.PrefetchScalarGridSpec(
            num_scalar_prefetch=0,
            grid=(B // block_b, depth),                      # depth innermost
            in_specs=[
                pl.BlockSpec((block_b, N, C), lambda b, d: (b, 0, 0)),   # x
                _layer_spec((1, C)), _layer_spec((1, C)),                # ln1 g/b
                _layer_spec((C, 3 * D)),                                 # w_qkv^T (scaled)
                _layer_spec((num_heads, hd, C)),                         # w_proj^T head-major
                _layer_spec((1, C)),                                     # b_proj
                _layer_spec((1, C)), _layer_spec((1, C)),                # ln2 g/b
                _layer_spec((C, hidden)), _layer_spec((1, hidden)),      # fc1
                _layer_spec((hidden, C)), _layer_spec((1, C)),           # fc2
            ],
            out_specs=pl.BlockSpec((block_b, N, C), lambda b, d: (b, 0, 0)),
        ),
        compiler_params=pltpu.CompilerParams(
            dimension_semantics=("parallel", "arbitrary"),
            vmem_limit_bytes=vmem_limit),
    )(x, ln1g, ln1b, w_qkv, w_proj, bproj, ln2g, ln2b, w_fc1, bfc1, w_fc2, bfc2)

    return _run_head(x, head, block_b=block_b, eps=eps,
                     compute_dtype=compute_dtype, budget=budget)


# --------------------------------------------------------------------------- #
# Pure-JAX reference (mirrors the PyTorch forward in eval mode, with the same
# matmul-boundary casts as the kernels so the comparison is tight)
# --------------------------------------------------------------------------- #
def decoder_forward_ref(x, blocks, head, *, num_heads, scale, eps=_LN_EPS,
                        compute_dtype=jnp.bfloat16):
    cd = compute_dtype
    f32 = jnp.float32

    def mm(a, b):
        return jnp.dot(a.astype(cd), b.astype(cd), preferred_element_type=f32)

    for p in blocks:
        B, N, C = x.shape
        D = p['w_proj'].shape[1]
        hd = D // num_heads
        xf = x.astype(f32)
        xn = _layer_norm(xf, p['ln1_g'], p['ln1_b'], eps).reshape(B * N, C)
        col_scale = jnp.concatenate([jnp.full((D,), scale, f32),
                                     jnp.ones((2 * D,), f32)])
        qkv = mm(xn, p['w_qkv'].astype(f32).T * col_scale[None, :])      # (B*N, 3D)
        q = qkv[:, :D].reshape(B, N, num_heads, hd).transpose(0, 2, 1, 3)
        k = qkv[:, D:2 * D].reshape(B, N, num_heads, hd).transpose(0, 2, 1, 3)
        v = qkv[:, 2 * D:].reshape(B, N, num_heads, hd).transpose(0, 2, 1, 3)
        s = jnp.einsum('bhqd,bhkd->bhqk', q.astype(cd), k.astype(cd),
                       preferred_element_type=f32)
        attn = jax.nn.softmax(s, axis=-1)
        o = jnp.einsum('bhqk,bhkd->bhqd', attn.astype(cd), v.astype(cd),
                       preferred_element_type=f32)
        o = o.transpose(0, 2, 1, 3).reshape(B * N, D)
        xf = xf + (mm(o, p['w_proj'].astype(f32).T) + p['b_proj']).reshape(B, N, C)
        hn = _layer_norm(xf, p['ln2_g'], p['ln2_b'], eps).reshape(B * N, C)
        z = _gelu_tanh(mm(hn, p['w_fc1'].astype(f32).T) + p['b_fc1'])
        z = mm(z, p['w_fc2'].astype(f32).T) + p['b_fc2']
        x = (xf + z.reshape(B, N, C)).astype(x.dtype)

    B, N, C = x.shape
    xn = _layer_norm(x.astype(f32), head['ln_g'], head['ln_b'], eps).reshape(B * N, C)
    y = mm(xn, head['w_head'].astype(f32).T) + head['b_head']
    return y.reshape(B, N, -1).astype(x.dtype)


# --------------------------------------------------------------------------- #
# Demo / self-test
# --------------------------------------------------------------------------- #
if __name__ == "__main__":
    # Small decoder consistent with the module: embed_dim=32, depth=2,
    # num_heads=4 (head_dim=8), mlp_ratio=4 -> hidden=128, seq N=8, batch B=2.
    # Head out_dim = in_chans * tubelet_size * prod(patch_size) with small
    # patches: 4 * 2 * (2*2*2) = 64.
    B, N, C = 2, 8, 32
    depth, num_heads, mlp_ratio = 2, 4, 4.0
    head_dim = C // num_heads
    scale = head_dim ** (-0.5)
    hidden = int(C * mlp_ratio)
    in_chans, tubelet_size, patch_size = 4, 2, (2, 2, 2)
    out_dim = in_chans * tubelet_size * math.prod(patch_size)

    key = jax.random.PRNGKey(0)
    key, kx = jax.random.split(key)
    x = jax.random.normal(kx, (B, N, C), dtype=jnp.float32)

    def nrm(k, shape, s=0.02):
        return s * jax.random.normal(k, shape, dtype=jnp.float32)

    blocks = []
    for _ in range(depth):
        key, *ks = jax.random.split(key, 12)
        blocks.append(dict(
            ln1_g=1.0 + 0.1 * jax.random.normal(ks[0], (C,), jnp.float32),
            ln1_b=nrm(ks[1], (C,), 0.05),
            w_qkv=nrm(ks[2], (3 * C, C)),          # qkv_bias=False
            w_proj=nrm(ks[3], (C, C)),
            b_proj=nrm(ks[4], (C,), 0.01),
            ln2_g=1.0 + 0.1 * jax.random.normal(ks[5], (C,), jnp.float32),
            ln2_b=nrm(ks[6], (C,), 0.05),
            w_fc1=nrm(ks[7], (hidden, C)),
            b_fc1=nrm(ks[8], (hidden,), 0.01),
            w_fc2=nrm(ks[9], (C, hidden)),
            b_fc2=nrm(ks[10], (C,), 0.01),
        ))

    key, k1, k2, k3, k4 = jax.random.split(key, 5)
    head = dict(
        ln_g=1.0 + 0.1 * jax.random.normal(k1, (C,), jnp.float32),
        ln_b=nrm(k2, (C,), 0.05),
        w_head=nrm(k3, (out_dim, C)),
        b_head=nrm(k4, (out_dim,), 0.01),
    )

    out = decoder_forward_pallas(x, blocks, head, num_heads=num_heads, scale=scale)
    out = jax.block_until_ready(out)

    ref = decoder_forward_ref(x, blocks, head, num_heads=num_heads, scale=scale)
    assert out.shape == (B, N, out_dim), out.shape
    max_err = float(jnp.max(jnp.abs(out - ref)))
    assert jnp.allclose(out, ref, atol=5e-3, rtol=5e-3), f"mismatch: {max_err}"

    print("KERNEL_OK")
</pallas_src>

<mosaic_0001>
module attributes {stable_mosaic.version = 11 : i64} {
  func.func @_blocks_kernel(%arg0: i32, %arg1: i32, %arg2: memref<1x8x32xf32, #tpu.memory_space<vmem>>, %arg3: memref<1x1x32xf32, #tpu.memory_space<vmem>>, %arg4: memref<1x1x32xf32, #tpu.memory_space<vmem>>, %arg5: memref<1x32x96xbf16, #tpu.memory_space<vmem>>, %arg6: memref<1x4x8x32xbf16, #tpu.memory_space<vmem>>, %arg7: memref<1x1x32xf32, #tpu.memory_space<vmem>>, %arg8: memref<1x1x32xf32, #tpu.memory_space<vmem>>, %arg9: memref<1x1x32xf32, #tpu.memory_space<vmem>>, %arg10: memref<1x32x128xbf16, #tpu.memory_space<vmem>>, %arg11: memref<1x1x128xf32, #tpu.memory_space<vmem>>, %arg12: memref<1x128x32xbf16, #tpu.memory_space<vmem>>, %arg13: memref<1x1x32xf32, #tpu.memory_space<vmem>>, %arg14: memref<1x8x32xf32, #tpu.memory_space<vmem>>) attributes {dimension_semantics = [#tpu.dimension_semantics<parallel>, #tpu.dimension_semantics<arbitrary>], iteration_bounds = array<i64: 2, 2>, scalar_prefetch = 0 : i64, scratch_operands = 0 : i64, tpu.core_type = #tpu.core_type<tc>, window_params = [{transform_indices = @transform_0, window_bounds = array<i64: 1, 8, 32>}, {transform_indices = @transform_1, window_bounds = array<i64: 1, 1, 32>}, {transform_indices = @transform_2, window_bounds = array<i64: 1, 1, 32>}, {transform_indices = @transform_3, window_bounds = array<i64: 1, 32, 96>}, {transform_indices = @transform_4, window_bounds = array<i64: 1, 4, 8, 32>}, {transform_indices = @transform_5, window_bounds = array<i64: 1, 1, 32>}, {transform_indices = @transform_6, window_bounds = array<i64: 1, 1, 32>}, {transform_indices = @transform_7, window_bounds = array<i64: 1, 1, 32>}, {transform_indices = @transform_8, window_bounds = array<i64: 1, 32, 128>}, {transform_indices = @transform_9, window_bounds = array<i64: 1, 1, 128>}, {transform_indices = @transform_10, window_bounds = array<i64: 1, 128, 32>}, {transform_indices = @transform_11, window_bounds = array<i64: 1, 1, 32>}, {transform_indices = @transform_12, window_bounds = array<i64: 1, 8, 32>}]} {
    %c0_i32 = arith.constant 0 : i32
    %0 = arith.cmpi eq, %arg1, %c0_i32 : i32
    %1 = arith.extui %0 : i1 to i32
    %c0_i32_0 = arith.constant 0 : i32
    %2 = arith.cmpi ne, %1, %c0_i32_0 : i32
    scf.if %2 {
      %c0_86 = arith.constant 0 : index
      %c0_87 = arith.constant 0 : index
      %c0_88 = arith.constant 0 : index
      %201 = vector.load %arg2[%c0_86, %c0_87, %c0_88] : memref<1x8x32xf32, #tpu.memory_space<vmem>>, vector<1x8x32xf32>
      %c0_89 = arith.constant 0 : index
      %c0_90 = arith.constant 0 : index
      %c0_91 = arith.constant 0 : index
      %202 = vector.load %arg14[%c0_89, %c0_90, %c0_91] : memref<1x8x32xf32, #tpu.memory_space<vmem>>, vector<1x8x32xf32>
      tpu.vector_store %arg14[%c0_89, %c0_90, %c0_91], %201 {strides = array<i32>} : memref<1x8x32xf32, #tpu.memory_space<vmem>>, vector<1x8x32xf32>,
    } else {
    }
    %c0 = arith.constant 0 : index
    %c0_1 = arith.constant 0 : index
    %c0_2 = arith.constant 0 : index
    %3 = vector.load %arg14[%c0, %c0_1, %c0_2] : memref<1x8x32xf32, #tpu.memory_space<vmem>>, vector<1x8x32xf32>
    %4 = vector.shape_cast %3 : vector<1x8x32xf32> to vector<8x32xf32>
    %c0_3 = arith.constant 0 : index
    %c0_4 = arith.constant 0 : index
    %c0_5 = arith.constant 0 : index
    %5 = vector.load %arg3[%c0_3, %c0_4, %c0_5] : memref<1x1x32xf32, #tpu.memory_space<vmem>>, vector<1x1x32xf32>
    %6 = vector.shape_cast %5 : vector<1x1x32xf32> to vector<1x32xf32>
    %c0_6 = arith.constant 0 : index
    %c0_7 = arith.constant 0 : index
    %c0_8 = arith.constant 0 : index
    %7 = vector.load %arg4[%c0_6, %c0_7, %c0_8] : memref<1x1x32xf32, #tpu.memory_space<vmem>>, vector<1x1x32xf32>
    %8 = vector.shape_cast %7 : vector<1x1x32xf32> to vector<1x32xf32>
    %cst = arith.constant dense<0.000000e+00> : vector<8xf32>
    %9 = vector.multi_reduction <add>, %4, %cst [1] : vector<8x32xf32> to vector<8xf32>
    %10 = vector.shape_cast %9 : vector<8xf32> to vector<8x1xf32>
    %cst_9 = arith.constant 3.200000e+01 : f32
    %11 = vector.broadcast %cst_9 : f32 to vector<8x1xf32>
    %12 = arith.divf %10, %11 : vector<8x1xf32>
    %13 = vector.broadcast %12 : vector<8x1xf32> to vector<8x32xf32>
    %14 = arith.subf %4, %13 : vector<8x32xf32>
    %15 = arith.mulf %14, %14 : vector<8x32xf32>
    %cst_10 = arith.constant dense<0.000000e+00> : vector<8xf32>
    %16 = vector.multi_reduction <add>, %15, %cst_10 [1] : vector<8x32xf32> to vector<8xf32>
    %17 = vector.shape_cast %16 : vector<8xf32> to vector<8x1xf32>
    %cst_11 = arith.constant 3.200000e+01 : f32
    %18 = vector.broadcast %cst_11 : f32 to vector<8x1xf32>
    %19 = arith.divf %17, %18 : vector<8x1xf32>
    %cst_12 = arith.constant 9.99999974E-6 : f32
    %20 = vector.broadcast %cst_12 : f32 to vector<8x1xf32>
    %21 = arith.addf %19, %20 : vector<8x1xf32>
    %22 = math.rsqrt %21 : vector<8x1xf32>
    %23 = vector.broadcast %22 : vector<8x1xf32> to vector<8x32xf32>
    %24 = arith.mulf %14, %23 : vector<8x32xf32>
    %25 = vector.broadcast %6 : vector<1x32xf32> to vector<8x32xf32>
    %26 = arith.mulf %24, %25 : vector<8x32xf32>
    %27 = vector.broadcast %8 : vector<1x32xf32> to vector<8x32xf32>
    %28 = arith.addf %26, %27 : vector<8x32xf32>
    %29 = arith.truncf %28 : vector<8x32xf32> to vector<8x32xbf16>
    %c0_13 = arith.constant 0 : index
    %c0_14 = arith.constant 0 : index
    %c0_15 = arith.constant 0 : index
    %30 = vector.load %arg5[%c0_13, %c0_14, %c0_15] : memref<1x32x96xbf16, #tpu.memory_space<vmem>>, vector<1x32x96xbf16>
    %31 = vector.shape_cast %30 : vector<1x32x96xbf16> to vector<32x96xbf16>
    %cst_16 = arith.constant dense<0.000000e+00> : vector<8x96xf32>
    %32 = tpu.matmul %29, %31, %cst_16 {dimension_numbers = #tpu.dot_dimension_numbers<[1], [0], [0], [1], [0, 0, 1, 1], [], []>} : vector<8x32xbf16>, vector<32x96xbf16>, vector<8x96xf32> -> vector<8x96xf32>
    %33 = vector.extract_strided_slice %32 {offsets = [0, 0], sizes = [8, 32], strides = [1, 1]} : vector<8x96xf32> to vector<8x32xf32>
    %34 = vector.shape_cast %33 : vector<8x32xf32> to vector<1x8x32xf32>
    %35 = vector.extract_strided_slice %32 {offsets = [0, 32], sizes = [8, 32], strides = [1, 1]} : vector<8x96xf32> to vector<8x32xf32>
    %36 = vector.shape_cast %35 : vector<8x32xf32> to vector<1x8x32xf32>
    %37 = vector.extract_strided_slice %32 {offsets = [0, 64], sizes = [8, 32], strides = [1, 1]} : vector<8x96xf32> to vector<8x32xf32>
    %38 = vector.shape_cast %37 : vector<8x32xf32> to vector<1x8x32xf32>
    %cst_17 = arith.constant 0.000000e+00 : f32
    %39 = vector.broadcast %cst_17 : f32 to vector<8x32xf32>
    %40 = vector.extract_strided_slice %34 {offsets = [0, 0, 0], sizes = [1, 8, 8], strides = [1, 1, 1]} : vector<1x8x32xf32> to vector<1x8x8xf32>
    %41 = vector.extract_strided_slice %36 {offsets = [0, 0, 0], sizes = [1, 8, 8], strides = [1, 1, 1]} : vector<1x8x32xf32> to vector<1x8x8xf32>
    %42 = vector.extract_strided_slice %38 {offsets = [0, 0, 0], sizes = [1, 8, 8], strides = [1, 1, 1]} : vector<1x8x32xf32> to vector<1x8x8xf32>
    %43 = arith.truncf %40 : vector<1x8x8xf32> to vector<1x8x8xbf16>
    %44 = arith.truncf %41 : vector<1x8x8xf32> to vector<1x8x8xbf16>
    "tpu.trace_start"() <{level = 10 : i32, message = "bqd,bkd->bqk"}> : () -> ()
    %cst_18 = arith.constant dense<0.000000e+00> : vector<1x8x8xf32>
    %45 = tpu.matmul %43, %44, %cst_18 {dimension_numbers = #tpu.dot_dimension_numbers<[2], [2], [1], [1], [0, 0, 0, 1, 1, 1], [0], [0]>} : vector<1x8x8xbf16>, vector<1x8x8xbf16>, vector<1x8x8xf32> -> vector<1x8x8xf32>
    "tpu.trace_stop"() : () -> ()
    %cst_19 = arith.constant dense<0xFF800000> : vector<1x8xf32>
    %46 = vector.multi_reduction <maximumf>, %45, %cst_19 [2] : vector<1x8x8xf32> to vector<1x8xf32>
    %47 = vector.shape_cast %46 : vector<1x8xf32> to vector<1x8x1xf32>
    %48 = vector.broadcast %47 : vector<1x8x1xf32> to vector<1x8x8xf32>
    %49 = arith.subf %45, %48 : vector<1x8x8xf32>
    %50 = math.exp %49 : vector<1x8x8xf32>
    %cst_20 = arith.constant dense<0.000000e+00> : vector<1x8xf32>
    %51 = vector.multi_reduction <add>, %50, %cst_20 [2] : vector<1x8x8xf32> to vector<1x8xf32>
    %52 = vector.shape_cast %51 : vector<1x8xf32> to vector<1x8x1xf32>
    %53 = tpu.reciprocal %52 {approx = true} : vector<1x8x1xf32> -> vector<1x8x1xf32>
    %54 = vector.broadcast %53 : vector<1x8x1xf32> to vector<1x8x8xf32>
    %55 = arith.mulf %50, %54 : vector<1x8x8xf32>
    %56 = arith.truncf %55 : vector<1x8x8xf32> to vector<1x8x8xbf16>
    %57 = arith.truncf %42 : vector<1x8x8xf32> to vector<1x8x8xbf16>
    "tpu.trace_start"() <{level = 10 : i32, message = "bqk,bkd->bqd"}> : () -> ()
    %cst_21 = arith.constant dense<0.000000e+00> : vector<1x8x8xf32>
    %58 = tpu.matmul %56, %57, %cst_21 {dimension_numbers = #tpu.dot_dimension_numbers<[2], [1], [1], [2], [0, 0, 0, 1, 1, 2], [0], [0]>} : vector<1x8x8xbf16>, vector<1x8x8xbf16>, vector<1x8x8xf32> -> vector<1x8x8xf32>
    "tpu.trace_stop"() : () -> ()
    %59 = vector.shape_cast %58 : vector<1x8x8xf32> to vector<8x8xf32>
    %60 = arith.truncf %59 : vector<8x8xf32> to vector<8x8xbf16>
    %c0_22 = arith.constant 0 : index
    %c0_23 = arith.constant 0 : index
    %c0_24 = arith.constant 0 : index
    %c0_25 = arith.constant 0 : index
    %61 = vector.load %arg6[%c0_22, %c0_23, %c0_24, %c0_25] : memref<1x4x8x32xbf16, #tpu.memory_space<vmem>>, vector<1x1x8x32xbf16>
    %62 = vector.shape_cast %61 : vector<1x1x8x32xbf16> to vector<8x32xbf16>
    %cst_26 = arith.constant dense<0.000000e+00> : vector<8x32xf32>
    %63 = tpu.matmul %60, %62, %cst_26 {dimension_numbers = #tpu.dot_dimension_numbers<[1], [0], [0], [1], [0, 0, 1, 1], [], []>} : vector<8x8xbf16>, vector<8x32xbf16>, vector<8x32xf32> -> vector<8x32xf32>
    %64 = arith.addf %39, %63 : vector<8x32xf32>
    %65 = vector.extract_strided_slice %34 {offsets = [0, 0, 8], sizes = [1, 8, 8], strides = [1, 1, 1]} : vector<1x8x32xf32> to vector<1x8x8xf32>
    %66 = vector.extract_strided_slice %36 {offsets = [0, 0, 8], sizes = [1, 8, 8], strides = [1, 1, 1]} : vector<1x8x32xf32> to vector<1x8x8xf32>
    %67 = vector.extract_strided_slice %38 {offsets = [0, 0, 8], sizes = [1, 8, 8], strides = [1, 1, 1]} : vector<1x8x32xf32> to vector<1x8x8xf32>
    %68 = arith.truncf %65 : vector<1x8x8xf32> to vector<1x8x8xbf16>
    %69 = arith.truncf %66 : vector<1x8x8xf32> to vector<1x8x8xbf16>
    "tpu.trace_start"() <{level = 10 : i32, message = "bqd,bkd->bqk"}> : () -> ()
    %cst_27 = arith.constant dense<0.000000e+00> : vector<1x8x8xf32>
    %70 = tpu.matmul %68, %69, %cst_27 {dimension_numbers = #tpu.dot_dimension_numbers<[2], [2], [1], [1], [0, 0, 0, 1, 1, 1], [0], [0]>} : vector<1x8x8xbf16>, vector<1x8x8xbf16>, vector<1x8x8xf32> -> vector<1x8x8xf32>
    "tpu.trace_stop"() : () -> ()
    %cst_28 = arith.constant dense<0xFF800000> : vector<1x8xf32>
    %71 = vector.multi_reduction <maximumf>, %70, %cst_28 [2] : vector<1x8x8xf32> to vector<1x8xf32>
    %72 = vector.shape_cast %71 : vector<1x8xf32> to vector<1x8x1xf32>
    %73 = vector.broadcast %72 : vector<1x8x1xf32> to vector<1x8x8xf32>
    %74 = arith.subf %70, %73 : vector<1x8x8xf32>
    %75 = math.exp %74 : vector<1x8x8xf32>
    %cst_29 = arith.constant dense<0.000000e+00> : vector<1x8xf32>
    %76 = vector.multi_reduction <add>, %75, %cst_29 [2] : vector<1x8x8xf32> to vector<1x8xf32>
    %77 = vector.shape_cast %76 : vector<1x8xf32> to vector<1x8x1xf32>
    %78 = tpu.reciprocal %77 {approx = true} : vector<1x8x1xf32> -> vector<1x8x1xf32>
    %79 = vector.broadcast %78 : vector<1x8x1xf32> to vector<1x8x8xf32>
    %80 = arith.mulf %75, %79 : vector<1x8x8xf32>
    %81 = arith.truncf %80 : vector<1x8x8xf32> to vector<1x8x8xbf16>
    %82 = arith.truncf %67 : vector<1x8x8xf32> to vector<1x8x8xbf16>
    "tpu.trace_start"() <{level = 10 : i32, message = "bqk,bkd->bqd"}> : () -> ()
    %cst_30 = arith.constant dense<0.000000e+00> : vector<1x8x8xf32>
    %83 = tpu.matmul %81, %82, %cst_30 {dimension_numbers = #tpu.dot_dimension_numbers<[2], [1], [1], [2], [0, 0, 0, 1, 1, 2], [0], [0]>} : vector<1x8x8xbf16>, vector<1x8x8xbf16>, vector<1x8x8xf32> -> vector<1x8x8xf32>
    "tpu.trace_stop"() : () -> ()
    %84 = vector.shape_cast %83 : vector<1x8x8xf32> to vector<8x8xf32>
    %85 = arith.truncf %84 : vector<8x8xf32> to vector<8x8xbf16>
    %c0_31 = arith.constant 0 : index
    %c1 = arith.constant 1 : index
    %c0_32 = arith.constant 0 : index
    %c0_33 = arith.constant 0 : index
    %86 = vector.load %arg6[%c0_31, %c1, %c0_32, %c0_33] : memref<1x4x8x32xbf16, #tpu.memory_space<vmem>>, vector<1x1x8x32xbf16>
    %87 = vector.shape_cast %86 : vector<1x1x8x32xbf16> to vector<8x32xbf16>
    %cst_34 = arith.constant dense<0.000000e+00> : vector<8x32xf32>
    %88 = tpu.matmul %85, %87, %cst_34 {dimension_numbers = #tpu.dot_dimension_numbers<[1], [0], [0], [1], [0, 0, 1, 1], [], []>} : vector<8x8xbf16>, vector<8x32xbf16>, vector<8x32xf32> -> vector<8x32xf32>
    %89 = arith.addf %64, %88 : vector<8x32xf32>
    %90 = vector.extract_strided_slice %34 {offsets = [0, 0, 16], sizes = [1, 8, 8], strides = [1, 1, 1]} : vector<1x8x32xf32> to vector<1x8x8xf32>
    %91 = vector.extract_strided_slice %36 {offsets = [0, 0, 16], sizes = [1, 8, 8], strides = [1, 1, 1]} : vector<1x8x32xf32> to vector<1x8x8xf32>
    %92 = vector.extract_strided_slice %38 {offsets = [0, 0, 16], sizes = [1, 8, 8], strides = [1, 1, 1]} : vector<1x8x32xf32> to vector<1x8x8xf32>
    %93 = arith.truncf %90 : vector<1x8x8xf32> to vector<1x8x8xbf16>
    %94 = arith.truncf %91 : vector<1x8x8xf32> to vector<1x8x8xbf16>
    "tpu.trace_start"() <{level = 10 : i32, message = "bqd,bkd->bqk"}> : () -> ()
    %cst_35 = arith.constant dense<0.000000e+00> : vector<1x8x8xf32>
    %95 = tpu.matmul %93, %94, %cst_35 {dimension_numbers = #tpu.dot_dimension_numbers<[2], [2], [1], [1], [0, 0, 0, 1, 1, 1], [0], [0]>} : vector<1x8x8xbf16>, vector<1x8x8xbf16>, vector<1x8x8xf32> -> vector<1x8x8xf32>
    "tpu.trace_stop"() : () -> ()
    %cst_36 = arith.constant dense<0xFF800000> : vector<1x8xf32>
    %96 = vector.multi_reduction <maximumf>, %95, %cst_36 [2] : vector<1x8x8xf32> to vector<1x8xf32>
    %97 = vector.shape_cast %96 : vector<1x8xf32> to vector<1x8x1xf32>
    %98 = vector.broadcast %97 : vector<1x8x1xf32> to vector<1x8x8xf32>
    %99 = arith.subf %95, %98 : vector<1x8x8xf32>
    %100 = math.exp %99 : vector<1x8x8xf32>
    %cst_37 = arith.constant dense<0.000000e+00> : vector<1x8xf32>
    %101 = vector.multi_reduction <add>, %100, %cst_37 [2] : vector<1x8x8xf32> to vector<1x8xf32>
    %102 = vector.shape_cast %101 : vector<1x8xf32> to vector<1x8x1xf32>
    %103 = tpu.reciprocal %102 {approx = true} : vector<1x8x1xf32> -> vector<1x8x1xf32>
    %104 = vector.broadcast %103 : vector<1x8x1xf32> to vector<1x8x8xf32>
    %105 = arith.mulf %100, %104 : vector<1x8x8xf32>
    %106 = arith.truncf %105 : vector<1x8x8xf32> to vector<1x8x8xbf16>
    %107 = arith.truncf %92 : vector<1x8x8xf32> to vector<1x8x8xbf16>
    "tpu.trace_start"() <{level = 10 : i32, message = "bqk,bkd->bqd"}> : () -> ()
    %cst_38 = arith.constant dense<0.000000e+00> : vector<1x8x8xf32>
    %108 = tpu.matmul %106, %107, %cst_38 {dimension_numbers = #tpu.dot_dimension_numbers<[2], [1], [1], [2], [0, 0, 0, 1, 1, 2], [0], [0]>} : vector<1x8x8xbf16>, vector<1x8x8xbf16>, vector<1x8x8xf32> -> vector<1x8x8xf32>
    "tpu.trace_stop"() : () -> ()
    %109 = vector.shape_cast %108 : vector<1x8x8xf32> to vector<8x8xf32>
    %110 = arith.truncf %109 : vector<8x8xf32> to vector<8x8xbf16>
    %c0_39 = arith.constant 0 : index
    %c2 = arith.constant 2 : index
    %c0_40 = arith.constant 0 : index
    %c0_41 = arith.constant 0 : index
    %111 = vector.load %arg6[%c0_39, %c2, %c0_40, %c0_41] : memref<1x4x8x32xbf16, #tpu.memory_space<vmem>>, vector<1x1x8x32xbf16>
    %112 = vector.shape_cast %111 : vector<1x1x8x32xbf16> to vector<8x32xbf16>
    %cst_42 = arith.constant dense<0.000000e+00> : vector<8x32xf32>
    %113 = tpu.matmul %110, %112, %cst_42 {dimension_numbers = #tpu.dot_dimension_numbers<[1], [0], [0], [1], [0, 0, 1, 1], [], []>} : vector<8x8xbf16>, vector<8x32xbf16>, vector<8x32xf32> -> vector<8x32xf32>
    %114 = arith.addf %89, %113 : vector<8x32xf32>
    %115 = vector.extract_strided_slice %34 {offsets = [0, 0, 24], sizes = [1, 8, 8], strides = [1, 1, 1]} : vector<1x8x32xf32> to vector<1x8x8xf32>
    %116 = vector.extract_strided_slice %36 {offsets = [0, 0, 24], sizes = [1, 8, 8], strides = [1, 1, 1]} : vector<1x8x32xf32> to vector<1x8x8xf32>
    %117 = vector.extract_strided_slice %38 {offsets = [0, 0, 24], sizes = [1, 8, 8], strides = [1, 1, 1]} : vector<1x8x32xf32> to vector<1x8x8xf32>
    %118 = arith.truncf %115 : vector<1x8x8xf32> to vector<1x8x8xbf16>
    %119 = arith.truncf %116 : vector<1x8x8xf32> to vector<1x8x8xbf16>
    "tpu.trace_start"() <{level = 10 : i32, message = "bqd,bkd->bqk"}> : () -> ()
    %cst_43 = arith.constant dense<0.000000e+00> : vector<1x8x8xf32>
    %120 = tpu.matmul %118, %119, %cst_43 {dimension_numbers = #tpu.dot_dimension_numbers<[2], [2], [1], [1], [0, 0, 0, 1, 1, 1], [0], [0]>} : vector<1x8x8xbf16>, vector<1x8x8xbf16>, vector<1x8x8xf32> -> vector<1x8x8xf32>
    "tpu.trace_stop"() : () -> ()
    %cst_44 = arith.constant dense<0xFF800000> : vector<1x8xf32>
    %121 = vector.multi_reduction <maximumf>, %120, %cst_44 [2] : vector<1x8x8xf32> to vector<1x8xf32>
    %122 = vector.shape_cast %121 : vector<1x8xf32> to vector<1x8x1xf32>
    %123 = vector.broadcast %122 : vector<1x8x1xf32> to vector<1x8x8xf32>
    %124 = arith.subf %120, %123 : vector<1x8x8xf32>
    %125 = math.exp %124 : vector<1x8x8xf32>
    %cst_45 = arith.constant dense<0.000000e+00> : vector<1x8xf32>
    %126 = vector.multi_reduction <add>, %125, %cst_45 [2] : vector<1x8x8xf32> to vector<1x8xf32>
    %127 = vector.shape_cast %126 : vector<1x8xf32> to vector<1x8x1xf32>
    %128 = tpu.reciprocal %127 {approx = true} : vector<1x8x1xf32> -> vector<1x8x1xf32>
    %129 = vector.broadcast %128 : vector<1x8x1xf32> to vector<1x8x8xf32>
    %130 = arith.mulf %125, %129 : vector<1x8x8xf32>
    %131 = arith.truncf %130 : vector<1x8x8xf32> to vector<1x8x8xbf16>
    %132 = arith.truncf %117 : vector<1x8x8xf32> to vector<1x8x8xbf16>
    "tpu.trace_start"() <{level = 10 : i32, message = "bqk,bkd->bqd"}> : () -> ()
    %cst_46 = arith.constant dense<0.000000e+00> : vector<1x8x8xf32>
    %133 = tpu.matmul %131, %132, %cst_46 {dimension_numbers = #tpu.dot_dimension_numbers<[2], [1], [1], [2], [0, 0, 0, 1, 1, 2], [0], [0]>} : vector<1x8x8xbf16>, vector<1x8x8xbf16>, vector<1x8x8xf32> -> vector<1x8x8xf32>
    "tpu.trace_stop"() : () -> ()
    %134 = vector.shape_cast %133 : vector<1x8x8xf32> to vector<8x8xf32>
    %135 = arith.truncf %134 : vector<8x8xf32> to vector<8x8xbf16>
    %c0_47 = arith.constant 0 : index
    %c3 = arith.constant 3 : index
    %c0_48 = arith.constant 0 : index
    %c0_49 = arith.constant 0 : index
    %136 = vector.load %arg6[%c0_47, %c3, %c0_48, %c0_49] : memref<1x4x8x32xbf16, #tpu.memory_space<vmem>>, vector<1x1x8x32xbf16>
    %137 = vector.shape_cast %136 : vector<1x1x8x32xbf16> to vector<8x32xbf16>
    %cst_50 = arith.constant dense<0.000000e+00> : vector<8x32xf32>
    %138 = tpu.matmul %135, %137, %cst_50 {dimension_numbers = #tpu.dot_dimension_numbers<[1], [0], [0], [1], [0, 0, 1, 1], [], []>} : vector<8x8xbf16>, vector<8x32xbf16>, vector<8x32xf32> -> vector<8x32xf32>
    %139 = arith.addf %114, %138 : vector<8x32xf32>
    %140 = arith.addf %4, %139 : vector<8x32xf32>
    %c0_51 = arith.constant 0 : index
    %c0_52 = arith.constant 0 : index
    %c0_53 = arith.constant 0 : index
    %141 = vector.load %arg7[%c0_51, %c0_52, %c0_53] : memref<1x1x32xf32, #tpu.memory_space<vmem>>, vector<1x1x32xf32>
    %142 = vector.shape_cast %141 : vector<1x1x32xf32> to vector<1x32xf32>
    %143 = vector.broadcast %142 : vector<1x32xf32> to vector<8x32xf32>
    %144 = arith.addf %140, %143 : vector<8x32xf32>
    %c0_54 = arith.constant 0 : index
    %c0_55 = arith.constant 0 : index
    %c0_56 = arith.constant 0 : index
    %145 = vector.load %arg8[%c0_54, %c0_55, %c0_56] : memref<1x1x32xf32, #tpu.memory_space<vmem>>, vector<1x1x32xf32>
    %146 = vector.shape_cast %145 : vector<1x1x32xf32> to vector<1x32xf32>
    %c0_57 = arith.constant 0 : index
    %c0_58 = arith.constant 0 : index
    %c0_59 = arith.constant 0 : index
    %147 = vector.load %arg9[%c0_57, %c0_58, %c0_59] : memref<1x1x32xf32, #tpu.memory_space<vmem>>, vector<1x1x32xf32>
    %148 = vector.shape_cast %147 : vector<1x1x32xf32> to vector<1x32xf32>
    %cst_60 = arith.constant dense<0.000000e+00> : vector<8xf32>
    %149 = vector.multi_reduction <add>, %144, %cst_60 [1] : vector<8x32xf32> to vector<8xf32>
    %150 = vector.shape_cast %149 : vector<8xf32> to vector<8x1xf32>
    %cst_61 = arith.constant 3.200000e+01 : f32
    %151 = vector.broadcast %cst_61 : f32 to vector<8x1xf32>
    %152 = arith.divf %150, %151 : vector<8x1xf32>
    %153 = vector.broadcast %152 : vector<8x1xf32> to vector<8x32xf32>
    %154 = arith.subf %144, %153 : vector<8x32xf32>
    %155 = arith.mulf %154, %154 : vector<8x32xf32>
    %cst_62 = arith.constant dense<0.000000e+00> : vector<8xf32>
    %156 = vector.multi_reduction <add>, %155, %cst_62 [1] : vector<8x32xf32> to vector<8xf32>
    %157 = vector.shape_cast %156 : vector<8xf32> to vector<8x1xf32>
    %cst_63 = arith.constant 3.200000e+01 : f32
    %158 = vector.broadcast %cst_63 : f32 to vector<8x1xf32>
    %159 = arith.divf %157, %158 : vector<8x1xf32>
    %cst_64 = arith.constant 9.99999974E-6 : f32
    %160 = vector.broadcast %cst_64 : f32 to vector<8x1xf32>
    %161 = arith.addf %159, %160 : vector<8x1xf32>
    %162 = math.rsqrt %161 : vector<8x1xf32>
    %163 = vector.broadcast %162 : vector<8x1xf32> to vector<8x32xf32>
    %164 = arith.mulf %154, %163 : vector<8x32xf32>
    %165 = vector.broadcast %146 : vector<1x32xf32> to vector<8x32xf32>
    %166 = arith.mulf %164, %165 : vector<8x32xf32>
    %167 = vector.broadcast %148 : vector<1x32xf32> to vector<8x32xf32>
    %168 = arith.addf %166, %167 : vector<8x32xf32>
    %169 = arith.truncf %168 : vector<8x32xf32> to vector<8x32xbf16>
    %c0_65 = arith.constant 0 : index
    %c0_66 = arith.constant 0 : index
    %c0_67 = arith.constant 0 : index
    %170 = vector.load %arg10[%c0_65, %c0_66, %c0_67] : memref<1x32x128xbf16, #tpu.memory_space<vmem>>, vector<1x32x128xbf16>
    %171 = vector.shape_cast %170 : vector<1x32x128xbf16> to vector<32x128xbf16>
    %cst_68 = arith.constant dense<0.000000e+00> : vector<8x128xf32>
    %172 = tpu.matmul %169, %171, %cst_68 {dimension_numbers = #tpu.dot_dimension_numbers<[1], [0], [0], [1], [0, 0, 1, 1], [], []>} : vector<8x32xbf16>, vector<32x128xbf16>, vector<8x128xf32> -> vector<8x128xf32>
    %c0_69 = arith.constant 0 : index
    %c0_70 = arith.constant 0 : index
    %c0_71 = arith.constant 0 : index
    %173 = vector.load %arg11[%c0_69, %c0_70, %c0_71] : memref<1x1x128xf32, #tpu.memory_space<vmem>>, vector<1x1x128xf32>
    %174 = vector.shape_cast %173 : vector<1x1x128xf32> to vector<1x128xf32>
    %175 = vector.broadcast %174 : vector<1x128xf32> to vector<8x128xf32>
    %176 = arith.addf %172, %175 : vector<8x128xf32>
    %cst_72 = arith.constant 5.000000e-01 : f32
    %177 = vector.broadcast %cst_72 : f32 to vector<8x128xf32>
    %178 = arith.mulf %177, %176 : vector<8x128xf32>
    %cst_73 = arith.constant 4.471500e-02 : f32
    %179 = vector.broadcast %cst_73 : f32 to vector<8x128xf32>
    %180 = arith.mulf %179, %176 : vector<8x128xf32>
    %181 = arith.mulf %180, %176 : vector<8x128xf32>
    %182 = arith.mulf %181, %176 : vector<8x128xf32>
    %183 = arith.addf %176, %182 : vector<8x128xf32>
    %cst_74 = arith.constant 0.797884583 : f32
    %184 = vector.broadcast %cst_74 : f32 to vector<8x128xf32>
    %185 = arith.mulf %184, %183 : vector<8x128xf32>
    %186 = math.tanh %185 : vector<8x128xf32>
    %cst_75 = arith.constant 1.000000e+00 : f32
    %187 = vector.broadcast %cst_75 : f32 to vector<8x128xf32>
    %188 = arith.addf %187, %186 : vector<8x128xf32>
    %189 = arith.mulf %178, %188 : vector<8x128xf32>
    %190 = arith.truncf %189 : vector<8x128xf32> to vector<8x128xbf16>
    %c0_76 = arith.constant 0 : index
    %c0_77 = arith.constant 0 : index
    %c0_78 = arith.constant 0 : index
    %191 = vector.load %arg12[%c0_76, %c0_77, %c0_78] : memref<1x128x32xbf16, #tpu.memory_space<vmem>>, vector<1x128x32xbf16>
    %192 = vector.shape_cast %191 : vector<1x128x32xbf16> to vector<128x32xbf16>
    %cst_79 = arith.constant dense<0.000000e+00> : vector<8x32xf32>
    %193 = tpu.matmul %190, %192, %cst_79 {dimension_numbers = #tpu.dot_dimension_numbers<[1], [0], [0], [1], [0, 0, 1, 1], [], []>} : vector<8x128xbf16>, vector<128x32xbf16>, vector<8x32xf32> -> vector<8x32xf32>
    %c0_80 = arith.constant 0 : index
    %c0_81 = arith.constant 0 : index
    %c0_82 = arith.constant 0 : index
    %194 = vector.load %arg13[%c0_80, %c0_81, %c0_82] : memref<1x1x32xf32, #tpu.memory_space<vmem>>, vector<1x1x32xf32>
    %195 = vector.shape_cast %194 : vector<1x1x32xf32> to vector<1x32xf32>
    %196 = vector.broadcast %195 : vector<1x32xf32> to vector<8x32xf32>
    %197 = arith.addf %193, %196 : vector<8x32xf32>
    %198 = arith.addf %144, %197 : vector<8x32xf32>
    %199 = vector.shape_cast %198 : vector<8x32xf32> to vector<1x8x32xf32>
    %c0_83 = arith.constant 0 : index
    %c0_84 = arith.constant 0 : index
    %c0_85 = arith.constant 0 : index
    %200 = vector.load %arg14[%c0_83, %c0_84, %c0_85] : memref<1x8x32xf32, #tpu.memory_space<vmem>>, vector<1x8x32xf32>
    tpu.vector_store %arg14[%c0_83, %c0_84, %c0_85], %199 {strides = array<i32>} : memref<1x8x32xf32, #tpu.memory_space<vmem>>, vector<1x8x32xf32>,
    return
  }
  func.func @transform_0(%arg0: i32, %arg1: i32) -> (i32, i32, i32) {
    %c0_i32 = arith.constant 0 : i32
    %c0_i32_0 = arith.constant 0 : i32
    %c0_i32_1 = arith.constant 0 : i32
    return %arg0, %c0_i32, %c0_i32_0 : i32, i32, i32
  }
  func.func @transform_1(%arg0: i32, %arg1: i32) -> (i32, i32, i32) {
    %c0_i32 = arith.constant 0 : i32
    %c0_i32_0 = arith.constant 0 : i32
    %c0_i32_1 = arith.constant 0 : i32
    return %arg1, %c0_i32, %c0_i32_0 : i32, i32, i32
  }
  func.func @transform_2(%arg0: i32, %arg1: i32) -> (i32, i32, i32) {
    %c0_i32 = arith.constant 0 : i32
    %c0_i32_0 = arith.constant 0 : i32
    %c0_i32_1 = arith.constant 0 : i32
    return %arg1, %c0_i32, %c0_i32_0 : i32, i32, i32
  }
  func.func @transform_3(%arg0: i32, %arg1: i32) -> (i32, i32, i32) {
    %c0_i32 = arith.constant 0 : i32
    %c0_i32_0 = arith.constant 0 : i32
    %c0_i32_1 = arith.constant 0 : i32
    return %arg1, %c0_i32, %c0_i32_0 : i32, i32, i32
  }
  func.func @transform_4(%arg0: i32, %arg1: i32) -> (i32, i32, i32, i32) {
    %c0_i32 = arith.constant 0 : i32
    %c0_i32_0 = arith.constant 0 : i32
    %c0_i32_1 = arith.constant 0 : i32
    %c0_i32_2 = arith.constant 0 : i32
    return %arg1, %c0_i32, %c0_i32_0, %c0_i32_1 : i32, i32, i32, i32
  }
  func.func @transform_5(%arg0: i32, %arg1: i32) -> (i32, i32, i32) {
    %c0_i32 = arith.constant 0 : i32
    %c0_i32_0 = arith.constant 0 : i32
    %c0_i32_1 = arith.constant 0 : i32
    return %arg1, %c0_i32, %c0_i32_0 : i32, i32, i32
  }
  func.func @transform_6(%arg0: i32, %arg1: i32) -> (i32, i32, i32) {
    %c0_i32 = arith.constant 0 : i32
    %c0_i32_0 = arith.constant 0 : i32
    %c0_i32_1 = arith.constant 0 : i32
    return %arg1, %c0_i32, %c0_i32_0 : i32, i32, i32
  }
  func.func @transform_7(%arg0: i32, %arg1: i32) -> (i32, i32, i32) {
    %c0_i32 = arith.constant 0 : i32
    %c0_i32_0 = arith.constant 0 : i32
    %c0_i32_1 = arith.constant 0 : i32
    return %arg1, %c0_i32, %c0_i32_0 : i32, i32, i32
  }
  func.func @transform_8(%arg0: i32, %arg1: i32) -> (i32, i32, i32) {
    %c0_i32 = arith.constant 0 : i32
    %c0_i32_0 = arith.constant 0 : i32
    %c0_i32_1 = arith.constant 0 : i32
    return %arg1, %c0_i32, %c0_i32_0 : i32, i32, i32
  }
  func.func @transform_9(%arg0: i32, %arg1: i32) -> (i32, i32, i32) {
    %c0_i32 = arith.constant 0 : i32
    %c0_i32_0 = arith.constant 0 : i32
    %c0_i32_1 = arith.constant 0 : i32
    return %arg1, %c0_i32, %c0_i32_0 : i32, i32, i32
  }
  func.func @transform_10(%arg0: i32, %arg1: i32) -> (i32, i32, i32) {
    %c0_i32 = arith.constant 0 : i32
    %c0_i32_0 = arith.constant 0 : i32
    %c0_i32_1 = arith.constant 0 : i32
    return %arg1, %c0_i32, %c0_i32_0 : i32, i32, i32
  }
  func.func @transform_11(%arg0: i32, %arg1: i32) -> (i32, i32, i32) {
    %c0_i32 = arith.constant 0 : i32
    %c0_i32_0 = arith.constant 0 : i32
    %c0_i32_1 = arith.constant 0 : i32
    return %arg1, %c0_i32, %c0_i32_0 : i32, i32, i32
  }
  func.func @transform_12(%arg0: i32, %arg1: i32) -> (i32, i32, i32) {
    %c0_i32 = arith.constant 0 : i32
    %c0_i32_0 = arith.constant 0 : i32
    %c0_i32_1 = arith.constant 0 : i32
    return %arg0, %c0_i32, %c0_i32_0 : i32, i32, i32
  }
}

</mosaic_0001>

<bundles_post_ra>
// kernel: tpu_custom_call.1
= control target key start
LH: loop header
LB: loop body
LE: loop exit
PB: predicated region body
PF: predicated region fallthrough
CT: control target
= control target key end

     0   :  { %s2629_s0 = inlined_call_operand.vmem [shape: f32[2,8,32], index: 0, kind: input, shape index: {}]   ;;  %s2630_s1 = inlined_call_operand.vmem [shape: f32[2,1,32], index: 1, kind: input, shape index: {}]   ;;  %s2631_s2 = inlined_call_operand.vmem [shape: f32[2,1,32], index: 2, kind: input, shape index: {}]   ;;  %s2632_s3 = inlined_call_operand.vmem [shape: bf16[2,32,96], index: 3, kind: input, shape index: {}]   ;;  %s2633_s4 = inlined_call_operand.vmem [shape: bf16[2,4,8,32], index: 4, kind: input, shape index: {}]   ;;  %s2634_s5 = inlined_call_operand.vmem [shape: f32[2,1,32], index: 5, kind: input, shape index: {}]   ;;  %s2635_s6 = inlined_call_operand.vmem [shape: f32[2,1,32], index: 6, kind: input, shape index: {}]   ;;  %s2636_s7 = inlined_call_operand.vmem [shape: f32[2,1,32], index: 7, kind: input, shape index: {}]   ;;  %s2637_s8 = inlined_call_operand.vmem [shape: bf16[2,32,128], index: 8, kind: input, shape index: {}]   ;;  %s2638_s9 = inlined_call_operand.vmem [shape: f32[2,1,128], index: 9, kind: input, shape index: {}]   ;;  %s2639_s10 = inlined_call_operand.vmem [shape: bf16[2,128,32], index: 10, kind: input, shape index: {}]   ;;  %s2640_s11 = inlined_call_operand.vmem [shape: f32[2,1,32], index: 11, kind: input, shape index: {}]   ;;  %s2641_s12 = inlined_call_operand.hbm [shape: f32[2,8,32], index: 12, kind: output, shape index: {}]  }
   0x1   :  { %2657 = sst [smem:[#allocation18_spill]] %s2629_s0 }
   0x2   :  { %2658 = sst [smem:[#allocation19_spill]] %s2632_s3 }
   0x3   :  { %2659 = sst [smem:[#allocation20_spill]] %s2633_s4 }
   0x4   :  { %2660 = sst [smem:[#allocation21_spill]] %s2641_s12 }
   0x5   :  { %17 = vsyncpa [#allocation3], 0 }
   0x6   :  { %19 = vsyncpa [#allocation3 + $0x1], 0  ;;  %s2259_s21 = smov 0   ;;  %s2261_s22 = smov 0  }
   0x7   :  { %s2263_s23 = smov 0   ;;  %s2265_s24 = smov 0  }
   0x8   :  { %s2267_s25 = smov 0   ;;  %s2269_s26 = smov 0  }
   0x9   :  { %s2271_s27 = smov 0   ;;  %s2273_s28 = smov 0  }
   0xa LB: > { %2661 = sst [smem:[#allocation5_spill]] %s2150_s21  ;;  %s1761_s29 = sadd.s32 4294967295, %s2178_s28   ;;  %s2178_s28 = sphi %s2273_s28, %s25_s28   ;;  %s2174_s27 = sphi %s2271_s27, %s2699_s27   ;;  %s2170_s26 = sphi %s2269_s26, %s2698_s26   ;;  %s2166_s25 = sphi %s2267_s25, %s2697_s25   ;;  %s2162_s24 = sphi %s2265_s24, %s2696_s24   ;;  %s2158_s23 = sphi %s2263_s23, %s2695_s23   ;;  %s2154_s22 = sphi %s2261_s22, %s2694_s22   ;;  %s2150_s21 = sphi %s2259_s21, %s2693_s21  }
   0xb   : > { %2662 = sst [smem:[#allocation6_spill]] %s2154_s22  ;;  %s1762_s30 = sadd.s32 4294967294, %s2178_s28  }
   0xc   : > { %2663 = sst [smem:[#allocation7_spill]] %s2158_s23  ;;  %s34_s13 = sadd.s32 1, %s2170_s26 }
   0xd   : > { %2664 = sst [smem:[#allocation8_spill]] %s2162_s24  ;;  %p35_p0 = scmp.ge.s32.totalorder %s34_s13, 2 }
   0xe   : > { %2665 = sst [smem:[#allocation9_spill]] %s2166_s25  ;;  %s37_s14 = sadd.s32 1, %s2174_s27 }
   0xf   : > { %2666 = sst [smem:[#allocation10_spill]] %s2170_s26  ;;  %p366_p1 = scmp.ne.s32.totalorder %s2158_s23, %s2154_s22 }
  0x10   : > { %2667 = sst [smem:[#allocation11_spill]] %s2174_s27  ;;  %p367_p2 = scmp.eq.s32.totalorder %s1761_s29, 3 }
  0x11   : > { %2668 = sst [smem:[#allocation12_spill]] %s2178_s28  ;;  %s2701_s13 = smov (%p35_p0, %s34_s13), 0 }
  0x12   : > { %2669 = sst [smem:[#allocation13_spill]] %s2701_s13  ;;  %s2703_s14 = smov (!%p35_p0, %s37_s14), %s2174_s27 }
  0x13   : > { %p2308_p3 = por %p367_p2, %p366_p1  ;;  %p372_p4 = scmp.ne.s32.totalorder %s2154_s22, %s2150_s21 }
  0x14   : > { %p39_p5 = scmp.ge.s32.totalorder %s2703_s14, 2  ;;  %p373_p6 = scmp.eq.s32.totalorder %s1762_s30, 3 }
  0x15   : > { %s2670_s15 = scalar_select %p2308_p3, 1, 0 }
  0x16   : > { %p1765_p7 = scmp.ge.s32.totalorder %s2178_s28, 1  ;;  %p472_p8 = scmp.lt.s32.totalorder %s2178_s28, 5 }
  0x17   : > { %2671 = sst [smem:[#allocation14_spill]] %s2670_s15  ;;  %s2705_s14 = smov (%p39_p5, %s2703_s14), 0 }
  0x18   : > { %2672 = sst [smem:[#allocation15_spill]] %s2705_s14  ;;  %p2318_p9 = por %p373_p6, %p372_p4 }
  0x19   : > { %p473_p10 = pnand %p1765_p7, %p472_p8  ;;  %s353_s17 = ssub.s32 %s2174_s27, %s2705_s14 }
  0x1a   : > { %s2673_s16 = scalar_select %p2318_p9, 1, 0 }
  0x1b   : > { %s356_s18 = sadd.s32 1, %s2158_s23  ;;  %p354_p11 = scmp.eq.s32.totalorder %s353_s17, 0 }
  0x1c   : > { %2674 = sst [smem:[#allocation16_spill]] %s2673_s16  ;;  %476 = sbr.rel (%p473_p10) target bundleno = 4076 (0xfec), region = 68 }
  0x1d   : > { %s2326_s19 = scalar_select %p354_p11, %s2158_s23, %s356_s18  }
  0x1e   : > { %s2645_s20 = sand.u32 (!%p473_p10), 1, %s2154_s22   ;;  %p554_p12 = scmp.lt.s32.totalorder (!%p473_p10), %s2166_s25, 1 }
  0x1f   : > { %2675 = sst [smem:[#allocation17_spill]] %s2326_s19  ;;  %s1766_s29 = sshll.u32 (!%p473_p10), %s2645_s20, 3 }
  0x20   : > { %p558_p13 = scmp.lt.s32.totalorder (!%p473_p10), %s2162_s24, 1  ;;  %s2676_s0 = sld [smem:[#allocation18_spill]] (!%p473_p10) }
  0x21   : > { %s555_s30 = scalar_select %p554_p12, %s2166_s25, 1 }
  0x22   : > { %s2335_s13 = scalar_select %p558_p13, %s2162_s24, 1 }
  0x23   : > { %s1767_s17 = sshll.u32 %s555_s30, 3  ;;  %s2677_s3 = sld [smem:[#allocation19_spill]] }
  0x24   : > { %s1817_s28 = sshll.u32 %s2335_s13, 4  ;;  %s2678_s4 = sld [smem:[#allocation20_spill]] }
  0x25   : > { %s579_s23 = scalar_lea.vmem %s2635_s6, %s2335_s13  ;;  %s598_s21 = scalar_lea.vmem %s2640_s11, %s2335_s13 }
  0x26   : > { %s557_s27 = scalar_lea.vmem %s2676_s0, %s1767_s17  ;;  %s2374_s0 = scalar_lea.vmem %s2637_s8, %s1817_s28 }
  0x27   : > { %s2390_s16 = scalar_lea.vmem [#allocation2], %s1766_s29  ;;  %s2679_s19 = sld [smem:[#allocation8_spill]] }
  0x29   : > { %s2352_s22 = scalar_lea.vmem %s2677_s3, %s1817_s28  ;;  %s590_s3 = scalar_lea.vmem %s2638_s9, %s2335_s13 }
  0x2a   : > { %s2357_s24 = scalar_lea.vmem %s2678_s4, %s1817_s28  ;;  %s1820_s4 = sshll.u32 %s2335_s13, 6 }
  0x2b   : > { %s2384_s26 = scalar_lea.vmem %s2639_s10, %s1820_s4 }
  0x2d   : > { %p1776_p0 = scmp.ne.s32.totalorder %s2679_s19, 0 }
  0x2f   : > { %603 = sbr.rel (%p1776_p0) target bundleno = 54 (0x36), region = 72 }
  0x34   : > { %v604_v0 = vld [vmem:[%s557_s27] sm:$0xff]  ;;  %vm605_vm0 = vcmask 261120  }
  0x35   : > { %606 = vst.msk [vmem:[%s2390_s16] sm:$0xff] %vm605_vm0, %v604_v0 }
  0x36 PF: > { %vm610_vm1 = vcmask 261120   ;;  %v2052_v8 = vld [vmem:[%s2352_s22 + $0x8] sm:$0xff]   ;;  %v2180_v9 = vmov 0.0   ;;  %vm2181_vm2 = vmmov 0   ;;  %v2053_v10 = vld [vmem:[%s2352_s22] sm:$0xff]   ;;  %s2680_s28 = scalar_lea.vmem %s2630_s1, %s2335_s13  ;;  %s2681_s29 = scalar_lea.vmem %s2631_s2, %s2335_s13  ;;  %vm703_vm3 = vcmask 64512  }
  0x37   : > { %1860 = vmatprep.subr.bf16.mxu1 %v2180_v9  ;;  %1864 = vmatprep.mubr.msk.bf16.mxu1 %vm2181_vm2, %v2180_v9  ;;  %v1777_v15 = vld [vmem:[%s2680_s28] ss:$0 sm:$0xff]  ;;  %s2182_s12 = smov 64   ;;  %s2183_s15 = smov 96   ;;  %vm767_vm4 = vcmask 1043456  }
  0x38   : > { %1861 = vmatpush3.bf16.msra.mxu1 %v2052_v8  ;;  %1886 = vmatprep.subr.bf16.mxu0 %v2180_v9  ;;  %v1778_v17 = vld [vmem:[%s2681_s29] ss:$0 sm:$0xff]  ;;  %s2184_s25 = smov 88   ;;  %s2185_s30 = smov 120   ;;  %v1786_v63 = vld [vmem:[%s2357_s24 + $0x4] sm:$0xf] }
  0x39   : > { %1862 = vmatprep.subr.bf16.mxu1 %v2180_v9  ;;  %1888 = vmatprep.mubr.msk.bf16.mxu0 %vm2181_vm2, %v2180_v9  ;;  %s2186_s14 = smov 56   ;;  %s2187_s17 = smov 80   ;;  %v930_v0 = vsel %vm767_vm4, %v1786_v63, 0 }
  0x3a   : > { %s2188_s20 = smov 112   ;;  %s2189_s18 = smov 48  }
  0x3b   : > { %s2190_s4 = smov 72   ;;  %s2191_s27 = smov 104  }
  0x3c   : > { %v2395_v1 = vld [vmem:[%s2390_s16] sm:$0xff]  ;;  %1863 = vmatpush3.bf16.msra.mxu1 %v2053_v10  ;;  %s2192_s28 = smov 40   ;;  %s2682_s19 = scalar_lea.vmem %s2634_s5, %s2335_s13 }
  0x3d   : > { %v611_v2 = vsel %vm610_vm1, %v2395_v1, 0.0  ;;  %1868 = vmatprep.subr.bf16.mxu1 %v2180_v9 }
  0x3e   : > { %612 = vadd.xlane.f32.xlu0 %v611_v2 }
  0xc7   : > { %v613_v3 = vpop.xlane.xlu0 %612 }
  0xc8   : > { %v615_v4 = vmul.f32 0.03125, %v613_v3 }
  0xca   : > { %v616_v5 = vsub.f32 %v2395_v1, %v615_v4  ;;  %v812_v4 = vld [vmem:[%s2357_s24] sm:$0xf] }
  0xcc   : > { %v617_v6 = vmul.f32 %v616_v5, %v616_v5 }
  0xce   : > { %v618_v7 = vsel %vm610_vm1, %v617_v6, 0.0 }
  0xcf   : > { %619 = vadd.xlane.f32.xlu0 %v618_v7  ;;  %v976_v7 = vsel %vm767_vm4, %v812_v4, 0  ;;  %v1795_v4 = vld [vmem:[%s2357_s24 + $0xc] sm:$0xf] }
 0x158   : > { %v620_v11 = vpop.xlane.xlu0 %619 }
 0x159   : > { %v621_v12 = vmul.f32 0.03125, %v620_v11 }
 0x15b   : > { %v622_v13 = vadd.f32 1e-05, %v621_v12 }
 0x15d   : > { %2064 = vrsqrt.f32 %v622_v13 }
 0x16a   : > { %v2065_v14 = vpop.eup %2064 }
 0x16b   : > { %v624_v16 = vmul.f32 %v2065_v14, %v616_v5 }
 0x16d   : > { %v631_v18 = vmul.f32 %v1777_v15, %v624_v16 }
 0x16f   : > { %v638_v19 = vadd.f32 %v1778_v17, %v631_v18 }
 0x171   : > { %v639_v20 = vpack.c.bf16 %v638_v19, %v638_v19 }
 0x173   : > { %1865 = vmatmul.mubr.msk.bf16.vlgmr.msra.gmra.mxu1 %vm610_vm1, %v639_v20 }
 0x174   : > { %1870 = vmatprep.mubr.msk.bf16.mxu1 %vm2181_vm2, %v2180_v9 }
 0x233   : > { %v693_v21 = vpop.f32.mrf.mxu1 }
 0x234   : > { %v2424_v22 = vpack.c.bf16 %v693_v21, %v693_v21 }
 0x235   : > { %v1866_v23 = vpop.f32.mrf.mxu1 }
 0x236   : > { %762 = vrot.lane.b32.xlu0 %v2424_v22, %s2182_s12  ;;  %701 = vrot.lane.b32.xlu1 %v2424_v22, %s2183_s15  ;;  %s2193_s12 = smov [#allocation2]  }
 0x237   : > { %v696_v24 = vpop.f32.mrf.mxu1  ;;  %s2090_s15 = sshll.u32 %s2193_s12, 4  ;;  %s2091_s15 = int_to_ptr.vmem [resolvable:$false] %s2090_s15 }
 0x239   : > { %v1867_v25 = vpop.f32.mrf.mxu1 }
 0x2a8   : > { %v702_v26 = vpop.permute.xlu1 %701  ;;  %v763_v28 = vpop.permute.xlu0 %762 }
 0x2a9   : > { %v708_v27 = vsel %vm703_vm3, %v702_v26, 0  ;;  %v769_v29 = vsel %vm767_vm4, %v763_v28, 0 }
 0x2aa   : > { %1869 = vmatpush3.bf16.xpose.msra.mxu1 %v708_v27 }
 0x2ab   : > { %1874 = vmatprep.subr.bf16.mxu1 %v2180_v9 }
 0x2b1   : > { %1871 = vmatmul.mubr.msk.bf16.vlgmr.msra.gmra.mxu1 %vm703_vm3, %v2424_v22 }
 0x2b2   : > { %1875 = vmatpush3.bf16.msra.mxu1 %v769_v29  ;;  %1876 = vmatprep.mubr.msk.bf16.mxu1 %vm2181_vm2, %v2180_v9 }
 0x2b3   : > { %1880 = vmatprep.subr.bf16.mxu1 %v2180_v9 }
 0x371   : > { %v744_v30 = vpop.f32.mrf.mxu1 }
 0x372   : > { %v750_v31 = vsel %vm703_vm3, %v744_v30, -inf }
 0x373   : > { %751 = vmax.xlane.f32.xlu1 %v750_v31  ;;  %v1872_v32 = vpop.f32.mrf.mxu1 }
 0x375   : > { %v747_v33 = vpop.f32.mrf.mxu1 }
 0x377   : > { %v1873_v34 = vpop.f32.mrf.mxu1 }
 0x3fc   : > { %v752_v35 = vpop.xlane.xlu1 %751 }
 0x3fd   : > { %v753_v36 = vsub.f32 %v744_v30, %v752_v35 }
 0x3ff   : > { %v754_v37 = vmul.f32 1.442695, %v753_v36 }
 0x401   : > { %2066 = vpow2.f32 %v754_v37 }
 0x40e   : > { %v2067_v38 = vpop.eup %2066 }
 0x40f   : > { %v756_v39 = vsel %vm703_vm3, %v2067_v38, 0.0 }
 0x410   : > { %757 = vadd.xlane.f32.xlu0 %v756_v39 }
 0x426   : > { %815 = vrot.lane.b32.xlu0 %v2424_v22, %s2184_s25  ;;  %s2092_s25 = scalar_lea.vmem %s2091_s15, 256 }
 0x42a   : > { %813 = vrot.lane.b32.xlu0 %v2424_v22, %s2185_s30 }
 0x499   : > { %v758_v40 = vpop.xlane.xlu0 %757 }
 0x49a   : > { %2068 = vrcp.f32 %v758_v40 }
 0x49d   : > { %v816_v43 = vpop.permute.xlu0 %815 }
 0x49e   : > { %v821_v45 = vsel %vm703_vm3, %v816_v43, 0 }
 0x4a1   : > { %v814_v46 = vpop.permute.xlu0 %813 }
 0x4a7   : > { %v2069_v41 = vpop.eup %2068 }
 0x4a8   : > { %v760_v42 = vmul.f32 %v2069_v41, %v2067_v38 }
 0x4aa   : > { %v761_v44 = vpack.c.bf16 %v760_v42, %v760_v42 }
 0x4ac   : > { %1877 = vmatmul.mubr.msk.bf16.vlgmr.msra.gmra.mxu1 %vm703_vm3, %v761_v44 }
 0x4ad   : > { %1881 = vmatpush3.bf16.xpose.msra.mxu1 %v821_v45  ;;  %1882 = vmatprep.mubr.msk.bf16.mxu1 %vm2181_vm2, %v2180_v9 }
 0x4ae   : > { %1892 = vmatprep.subr.bf16.mxu1 %v2180_v9 }
 0x4b4   : > { %1883 = vmatmul.mubr.msk.bf16.vlgmr.msra.gmra.mxu1 %vm703_vm3, %v814_v46  ;;  %v1791_v46 = vld [vmem:[%s2357_s24 + $0x8] sm:$0xf]  ;;  %s2687_s24 = sld [smem:[#allocation21_spill]] }
 0x4b5   : > { %1894 = vmatprep.mubr.msk.bf16.mxu1 %vm2181_vm2, %v2180_v9  ;;  %1893 = vmatpush3.bf16.msra.mxu1 %v930_v0 }
 0x4b6   : > { %1904 = vmatprep.subr.bf16.mxu1 %v2180_v9 }
 0x56c   : > { %v805_v47 = vpop.f32.mrf.mxu1 }
 0x56d   : > { %v811_v10 = vpack.c.bf16 %v805_v47, %v805_v47  ;;  %v1135_v47 = vsel %vm767_vm4, %v1791_v46, 0  ;;  %v2057_v46 = vld [vmem:[%s2384_s26 + $0x30] sm:$0xff]  }
 0x56e   : > { %v1878_v48 = vpop.f32.mrf.mxu1 }
 0x570   : > { %v808_v49 = vpop.f32.mrf.mxu1 }
 0x572   : > { %v1879_v50 = vpop.f32.mrf.mxu1 }
 0x574   : > { %v857_v51 = vpop.f32.mrf.mxu1 }
 0x575   : > { %v863_v52 = vsel %vm703_vm3, %v857_v51, -inf }
 0x576   : > { %864 = vmax.xlane.f32.xlu1 %v863_v52  ;;  %v1884_v53 = vpop.f32.mrf.mxu1 }
 0x578   : > { %v860_v54 = vpop.f32.mrf.mxu1 }
 0x57a   : > { %v1885_v55 = vpop.f32.mrf.mxu1 }
 0x587   : > { %875 = vrot.lane.b32.xlu1 %v2424_v22, %s2186_s14  ;;  %s2684_s14 = sld [smem:[#allocation9_spill]] }
 0x58b   : > { %1020 = vrot.lane.b32.xlu1 %v2424_v22, %s2187_s17 }
 0x58f   : > { %1018 = vrot.lane.b32.xlu1 %v2424_v22, %s2188_s20 }
 0x5ff   : > { %v865_v56 = vpop.xlane.xlu1 %864 }
 0x600   : > { %v866_v57 = vsub.f32 %v857_v51, %v865_v56 }
 0x602   : > { %v867_v58 = vmul.f32 1.442695, %v866_v57 }
 0x603   : > { %v876_v59 = vpop.permute.xlu1 %875 }
 0x604   : > { %2070 = vpow2.f32 %v867_v58  ;;  %v881_v60 = vsel %vm767_vm4, %v876_v59, 0 }
 0x605   : > { %1887 = vmatpush3.bf16.msra.mxu0 %v881_v60 }
 0x606   : > { %1898 = vmatprep.subr.bf16.mxu0 %v2180_v9 }
 0x607   : > { %v1021_v12 = vpop.permute.xlu1 %1020 }
 0x608   : > { %v1026_v16 = vsel %vm703_vm3, %v1021_v12, 0 }
 0x60b   : > { %v1019_v20 = vpop.permute.xlu1 %1018 }
 0x611   : > { %v2071_v61 = vpop.eup %2070 }
 0x612   : > { %v869_v62 = vsel %vm703_vm3, %v2071_v61, 0.0 }
 0x613   : > { %870 = vadd.xlane.f32.xlu0 %v869_v62 }
 0x629   : > { %1080 = vrot.lane.b32.xlu0 %v2424_v22, %s2189_s18  ;;  %s1814_s18 = sshll.u32 %s2684_s14, 7 }
 0x62a   : > { %s2573_s22 = scalar_lea.hbm %s2687_s24, %s1814_s18 }
 0x69c   : > { %v871_v2 = vpop.xlane.xlu0 %870 }
 0x69d   : > { %2072 = vrcp.f32 %v871_v2 }
 0x6a0   : > { %v1081_v8 = vpop.permute.xlu0 %1080 }
 0x6a1   : > { %v1086_v11 = vsel %vm767_vm4, %v1081_v8, 0 }
 0x6aa   : > { %v2073_v3 = vpop.eup %2072 }
 0x6ab   : > { %v873_v5 = vmul.f32 %v2073_v3, %v2071_v61 }
 0x6ad   : > { %v874_v6 = vpack.c.bf16 %v873_v5, %v873_v5  ;;  %v1295_v5 = vsel %vm767_vm4, %v1795_v4, 0 }
 0x6af   : > { %1889 = vmatmul.mubr.msk.bf16.vlgmr.msra.gmra.mxu0 %vm703_vm3, %v874_v6 }
 0x6b0   : > { %1899 = vmatpush3.bf16.msra.mxu0 %v976_v7  ;;  %1900 = vmatprep.mubr.msk.bf16.mxu0 %vm2181_vm2, %v2180_v9 }
 0x6b1   : > { %1910 = vmatprep.subr.bf16.mxu0 %v2180_v9 }
 0x6b7   : > { %1901 = vmatmul.mubr.msk.bf16.vlgmr.msra.gmra.mxu0 %vm703_vm3, %v811_v10 }
 0x6b8   : > { %1911 = vmatpush3.bf16.msra.mxu0 %v1086_v11  ;;  %1912 = vmatprep.mubr.msk.bf16.mxu0 %vm2181_vm2, %v2180_v9 }
 0x6b9   : > { %1922 = vmatprep.subr.bf16.mxu0 %v2180_v9 }
 0x76f   : > { %v917_v13 = vpop.f32.mrf.mxu0 }
 0x770   : > { %v923_v14 = vpack.c.bf16 %v917_v13, %v917_v13 }
 0x771   : > { %v1890_v15 = vpop.f32.mrf.mxu0 }
 0x772   : > { %1895 = vmatmul.mubr.msk.bf16.vlgmr.msra.gmra.mxu1 %vm703_vm3, %v923_v14 }
 0x773   : > { %1905 = vmatpush3.bf16.xpose.msra.mxu1 %v1026_v16  ;;  %v920_v17 = vpop.f32.mrf.mxu0  ;;  %1906 = vmatprep.mubr.msk.bf16.mxu1 %vm2181_vm2, %v2180_v9 }
 0x774   : > { %1916 = vmatprep.subr.bf16.mxu1 %v2180_v9 }
 0x775   : > { %v1891_v18 = vpop.f32.mrf.mxu0 }
 0x777   : > { %v2475_v19 = vpop.f32.mrf.mxu0 }
 0x779   : > { %v1902_v21 = vpop.f32.mrf.mxu0 }
 0x77a   : > { %1907 = vmatmul.mubr.msk.bf16.vlgmr.msra.gmra.mxu1 %vm703_vm3, %v1019_v20  ;;  %v1797_v21 = vld [vmem:[%s2682_s19] ss:$0 sm:$0xff]  ;;  %s2688_s19 = smov %s2687_s24 }
 0x77b   : > { %v1015_v23 = vpop.f32.mrf.mxu0  ;;  %1918 = vmatprep.mubr.msk.bf16.mxu1 %vm2181_vm2, %v2180_v9  ;;  %1917 = vmatpush3.bf16.msra.mxu1 %v1135_v47  ;;  %v2058_v47 = vld [vmem:[%s2384_s26 + $0x28] sm:$0xff]  }
 0x77c   : > { %1928 = vmatprep.subr.bf16.mxu1 %v2180_v9 }
 0x77d   : > { %v1903_v24 = vpop.f32.mrf.mxu0 }
 0x832   : > { %v2480_v25 = vpop.f32.mrf.mxu1 }
 0x833   : > { %v1013_v2 = vadd.f32 %v2475_v19, %v2480_v25 }
 0x834   : > { %v1896_v26 = vpop.f32.mrf.mxu1 }
 0x836   : > { %v969_v27 = vpop.f32.mrf.mxu1 }
 0x838   : > { %v1897_v28 = vpop.f32.mrf.mxu1 }
 0x83a   : > { %v1062_v29 = vpop.f32.mrf.mxu1 }
 0x83b   : > { %v1068_v30 = vsel %vm703_vm3, %v1062_v29, -inf }
 0x83c   : > { %1069 = vmax.xlane.f32.xlu1 %v1068_v30  ;;  %v1908_v31 = vpop.f32.mrf.mxu1 }
 0x83e   : > { %v1065_v32 = vpop.f32.mrf.mxu1 }
 0x840   : > { %v1909_v33 = vpop.f32.mrf.mxu1 }
 0x8c5   : > { %v1070_v34 = vpop.xlane.xlu1 %1069 }
 0x8c6   : > { %v1071_v35 = vsub.f32 %v1062_v29, %v1070_v34  ;;  %v2054_v34 = vld [vmem:[%s2374_s0 + $0x8] sm:$0xff]  }
 0x8c8   : > { %v1072_v36 = vmul.f32 1.442695, %v1071_v35 }
 0x8ca   : > { %2074 = vpow2.f32 %v1072_v36 }
 0x8d7   : > { %v2075_v37 = vpop.eup %2074 }
 0x8d8   : > { %v1074_v38 = vsel %vm703_vm3, %v2075_v37, 0.0 }
 0x8d9   : > { %1075 = vadd.xlane.f32.xlu0 %v1074_v38 }
 0x8ef   : > { %1180 = vrot.lane.b32.xlu0 %v2424_v22, %s2190_s4  ;;  %s1580_s4 = sshll.u32 %s2390_s16, 4  ;;  %s2575_s4 = int_to_ptr.vmem [resolvable:$true] %s1580_s4 }
 0x8f0   : > { %s2086_s29 = scalar_lea.vmem %s2575_s4, 128  ;;  %p2093_p5 = scmp.lt.s32.totalorder %s2575_s4, %s2091_s15 }
 0x8f1   : > { %p2087_p1 = scmp.ne.s32.totalorder %s2575_s4, %s2086_s29  ;;  %p2094_p6 = scmp.lt.s32.totalorder %s2092_s25, %s2086_s29 }
 0x8f3   : > { %1178 = vrot.lane.b32.xlu0 %v2424_v22, %s2191_s27  ;;  %p2088_p2 = pnand %p2087_p1, %p2308_p3  ;;  %p2095_p7 = por %p2094_p6, %p2093_p5 }
 0x8f5   : > { %p2089_p4 = pneg %p2088_p2 }
 0x8f7   : > { %p2096_p8 = pnand %p2095_p7, %p2089_p4 }
 0x962   : > { %v1076_v39 = vpop.xlane.xlu0 %1075 }
 0x963   : > { %2076 = vrcp.f32 %v1076_v39  ;;  %v1798_v39 = vld [vmem:[%s579_s23] ss:$0 sm:$0xff] }
 0x966   : > { %v1181_v42 = vpop.permute.xlu0 %1180 }
 0x967   : > { %v1186_v44 = vsel %vm703_vm3, %v1181_v42, 0 }
 0x96a   : > { %v1179_v45 = vpop.permute.xlu0 %1178 }
 0x970   : > { %v2077_v40 = vpop.eup %2076 }
 0x971   : > { %v1078_v41 = vmul.f32 %v2077_v40, %v2075_v37 }
 0x973   : > { %v1079_v43 = vpack.c.bf16 %v1078_v41, %v1078_v41 }
 0x975   : > { %1913 = vmatmul.mubr.msk.bf16.vlgmr.msra.gmra.mxu0 %vm703_vm3, %v1079_v43 }
 0x976   : > { %1923 = vmatpush3.bf16.xpose.msra.mxu0 %v1186_v44  ;;  %1924 = vmatprep.mubr.msk.bf16.mxu0 %vm2181_vm2, %v2180_v9 }
 0x977   : > { %1934 = vmatprep.subr.bf16.mxu0 %v2180_v9 }
 0x97d   : > { %1925 = vmatmul.mubr.msk.bf16.vlgmr.msra.gmra.mxu0 %vm703_vm3, %v1179_v45  ;;  %v2056_v45 = vld [vmem:[%s2384_s26 + $0x38] sm:$0xff]  }
 0x97e   : > { %1936 = vmatprep.mubr.msk.bf16.mxu0 %vm2181_vm2, %v2180_v9  ;;  %1935 = vmatpush3.bf16.msra.mxu0 %v1295_v5 }
 0x97f   : > { %1948 = vmatprep.subr.bf16.mxu0 %v2180_v9 }
 0xa35   : > { %v1122_v48 = vpop.f32.mrf.mxu0 }
 0xa36   : > { %v1128_v49 = vpack.c.bf16 %v1122_v48, %v1122_v48  ;;  %v2059_v48 = vld [vmem:[%s2384_s26 + $0x20] sm:$0xff]  }
 0xa37   : > { %v1914_v50 = vpop.f32.mrf.mxu0 }
 0xa38   : > { %1919 = vmatmul.mubr.msk.bf16.vlgmr.msra.gmra.mxu1 %vm703_vm3, %v1128_v49  ;;  %v2060_v49 = vld [vmem:[%s2384_s26 + $0x18] sm:$0xff]   ;;  %v2061_v50 = vld [vmem:[%s2384_s26 + $0x10] sm:$0xff]  }
 0xa39   : > { %v1125_v51 = vpop.f32.mrf.mxu0  ;;  %1930 = vmatprep.mubr.msk.bf16.mxu1 %vm2181_vm2, %v2180_v9 }
 0xa3a   : > { %v2062_v51 = vld [vmem:[%s2384_s26 + $0x8] sm:$0xff]  }
 0xa3b   : > { %v1915_v52 = vpop.f32.mrf.mxu0 }
 0xa3c   : > { %v2063_v52 = vld [vmem:[%s2384_s26] sm:$0xff]   ;;  %s2685_s26 = sld [smem:[#allocation6_spill]] }
 0xa3d   : > { %v1222_v53 = vpop.f32.mrf.mxu0 }
 0xa3e   : > { %v1228_v54 = vsel %vm703_vm3, %v1222_v53, -inf }
 0xa3f   : > { %1229 = vmax.xlane.f32.xlu1 %v1228_v54  ;;  %v1926_v55 = vpop.f32.mrf.mxu0 }
 0xa41   : > { %v1225_v56 = vpop.f32.mrf.mxu0 }
 0xa43   : > { %v1927_v57 = vpop.f32.mrf.mxu0 }
 0xa50   : > { %1240 = vrot.lane.b32.xlu1 %v2424_v22, %s2192_s28 }
 0xac8   : > { %v1230_v58 = vpop.xlane.xlu1 %1229 }
 0xac9   : > { %v1231_v59 = vsub.f32 %v1222_v53, %v1230_v58  ;;  %v1800_v53 = vld [vmem:[%s590_s3] ss:$0 sm:$0xff] }
 0xacb   : > { %v1232_v60 = vmul.f32 1.442695, %v1231_v59 }
 0xacc   : > { %v1241_v61 = vpop.permute.xlu1 %1240 }
 0xacd   : > { %2078 = vpow2.f32 %v1232_v60  ;;  %v1246_v62 = vsel %vm767_vm4, %v1241_v61, 0 }
 0xace   : > { %1929 = vmatpush3.bf16.msra.mxu1 %v1246_v62 }
 0xacf   : > { %1940 = vmatprep.subr.bf16.mxu1 %v2180_v9 }
 0xada   : > { %v2079_v63 = vpop.eup %2078 }
 0xadb   : > { %v1234_v0 = vsel %vm703_vm3, %v2079_v63, 0.0 }
 0xadc   : > { %1235 = vadd.xlane.f32.xlu0 %v1234_v0 }
 0xaf8   : > { %v1171_v3 = vpop.f32.mrf.mxu1 }
 0xaf9   : > { %v1177_v22 = vadd.f32 %v1171_v3, %v1013_v2 }
 0xafa   : > { %v1920_v6 = vpop.f32.mrf.mxu1 }
 0xafc   : > { %v1174_v7 = vpop.f32.mrf.mxu1 }
 0xafe   : > { %v1921_v8 = vpop.f32.mrf.mxu1 }
 0xb65   : > { %v1236_v10 = vpop.xlane.xlu0 %1235 }
 0xb66   : > { %2080 = vrcp.f32 %v1236_v10 }
 0xb73   : > { %v2081_v11 = vpop.eup %2080 }
 0xb74   : > { %v1238_v12 = vmul.f32 %v2081_v11, %v2079_v63 }
 0xb76   : > { %v1239_v13 = vpack.c.bf16 %v1238_v12, %v1238_v12 }
 0xb78   : > { %1931 = vmatmul.mubr.msk.bf16.vlgmr.msra.gmra.mxu1 %vm703_vm3, %v1239_v13 }
 0xb79   : > { %1944 = vmatprep.mubr.msk.bf16.mxu1 %vm2181_vm2, %v2180_v9  ;;  %1941 = vmatpush3.bf16.msra.mxu1 %v2054_v34 }
 0xb7a   : > { %1942 = vmatprep.subr.bf16.mxu1 %v2180_v9 }
 0xc38   : > { %v1282_v14 = vpop.f32.mrf.mxu1 }
 0xc39   : > { %v1288_v15 = vpack.c.bf16 %v1282_v14, %v1282_v14 }
 0xc3a   : > { %v1932_v16 = vpop.f32.mrf.mxu1 }
 0xc3b   : > { %1937 = vmatmul.mubr.msk.bf16.vlgmr.msra.gmra.mxu0 %vm703_vm3, %v1288_v15 }
 0xc3c   : > { %v1285_v17 = vpop.f32.mrf.mxu1  ;;  %1964 = vmatprep.mubr.msk.bf16.mxu0 %vm2181_vm2, %v2180_v9  ;;  %1949 = vmatpush3.bf16.msra.mxu0 %v2056_v45 }
 0xc3d   : > { %1950 = vmatprep.subr.bf16.mxu0 %v2180_v9 }
 0xc3e   : > { %v1933_v18 = vpop.f32.mrf.mxu1 }
 0xc40   : > { %1951 = vmatpush3.bf16.msra.mxu0 %v2057_v46 }
 0xc41   : > { %1952 = vmatprep.subr.bf16.mxu0 %v2180_v9 }
 0xc44   : > { %1953 = vmatpush3.bf16.msra.mxu0 %v2058_v47 }
 0xc45   : > { %1954 = vmatprep.subr.bf16.mxu0 %v2180_v9 }
 0xc48   : > { %1955 = vmatpush3.bf16.msra.mxu0 %v2059_v48 }
 0xc49   : > { %1956 = vmatprep.subr.bf16.mxu0 %v2180_v9 }
 0xc4c   : > { %1957 = vmatpush3.bf16.msra.mxu0 %v2060_v49 }
 0xc4d   : > { %1958 = vmatprep.subr.bf16.mxu0 %v2180_v9 }
 0xc50   : > { %1959 = vmatpush3.bf16.msra.mxu0 %v2061_v50 }
 0xc51   : > { %1960 = vmatprep.subr.bf16.mxu0 %v2180_v9 }
 0xc54   : > { %1961 = vmatpush3.bf16.msra.mxu0 %v2062_v51 }
 0xc55   : > { %1962 = vmatprep.subr.bf16.mxu0 %v2180_v9 }
 0xc58   : > { %1963 = vmatpush3.bf16.msra.mxu0 %v2063_v52 }
 0xcfb   : > { %v1331_v19 = vpop.f32.mrf.mxu0 }
 0xcfc   : > { %v1337_v20 = vadd.f32 %v1331_v19, %v1177_v22  ;;  %v1804_v22 = vld [vmem:[%s598_s21] ss:$0 sm:$0xff] }
 0xcfd   : > { %v1938_v23 = vpop.f32.mrf.mxu0 }
 0xcfe   : > { %v1338_v24 = vadd.f32 %v1337_v20, %v2395_v1  ;;  %v2055_v1 = vld [vmem:[%s2374_s0] sm:$0xff]   ;;  %s2683_s0 = scalar_lea.vmem %s2636_s7, %s2335_s13  ;;  %s2689_s13 = sand.u32 1, %s2685_s26  }
 0xcff   : > { %v1334_v25 = vpop.f32.mrf.mxu0  ;;  %1943 = vmatpush3.bf16.msra.mxu1 %v2055_v1  ;;  %v1799_v41 = vld [vmem:[%s2683_s0] ss:$0 sm:$0xff]  ;;  %s1567_s21 = scalar_lea.sflag [#allocation3], %s2689_s13 }
 0xd00   : > { %v2522_v26 = vadd.f32 %v1797_v21, %v1338_v24 }
 0xd01   : > { %v1939_v27 = vpop.f32.mrf.mxu0 }
 0xd02   : > { %v1349_v28 = vsel %vm610_vm1, %v2522_v26, 0.0 }
 0xd03   : > { %1350 = vadd.xlane.f32.xlu1 %v1349_v28 }
 0xd8c   : > { %v1351_v29 = vpop.xlane.xlu1 %1350 }
 0xd8d   : > { %v1352_v30 = vmul.f32 0.03125, %v1351_v29 }
 0xd8f   : > { %v1353_v31 = vsub.f32 %v2522_v26, %v1352_v30 }
 0xd91   : > { %v1354_v32 = vmul.f32 %v1353_v31, %v1353_v31 }
 0xd93   : > { %v1355_v33 = vsel %vm610_vm1, %v1354_v32, 0.0 }
 0xd94   : > { %1356 = vadd.xlane.f32.xlu0 %v1355_v33 }
 0xe1d   : > { %v1357_v35 = vpop.xlane.xlu0 %1356 }
 0xe1e   : > { %v1358_v36 = vmul.f32 0.03125, %v1357_v35 }
 0xe20   : > { %v1359_v37 = vadd.f32 1e-05, %v1358_v36 }
 0xe22   : > { %2082 = vrsqrt.f32 %v1359_v37 }
 0xe2f   : > { %v2083_v38 = vpop.eup %2082 }
 0xe30   : > { %v1361_v40 = vmul.f32 %v2083_v38, %v1353_v31 }
 0xe32   : > { %v1368_v42 = vmul.f32 %v1798_v39, %v1361_v40 }
 0xe34   : > { %v1375_v43 = vadd.f32 %v1799_v41, %v1368_v42 }
 0xe36   : > { %v1376_v44 = vpack.c.bf16 %v1375_v43, %v1375_v43 }
 0xe38   : > { %1945 = vmatmul.mubr.msk.bf16.vlgmr.msra.gmra.mxu1 %vm610_vm1, %v1376_v44 }
 0xef8   : > { %v1437_v54 = vpop.f32.mrf.mxu1 }
 0xef9   : > { %v1438_v55 = vadd.f32 %v1800_v53, %v1437_v54 }
 0xefa   : > { %v1946_v56 = vpop.f32.mrf.mxu1 }
 0xefb   : > { %v1444_v57 = vmul.f32 0.044715, %v1438_v55  ;;  %v1443_v0 = vmul.f32 0.5, %v1438_v55 }
 0xefc   : > { %v1440_v58 = vpop.f32.mrf.mxu1 }
 0xefd   : > { %v1445_v59 = vmul.f32 %v1444_v57, %v1438_v55 }
 0xefe   : > { %v1947_v60 = vpop.f32.mrf.mxu1 }
 0xeff   : > { %v1446_v61 = vmul.f32 %v1445_v59, %v1438_v55 }
 0xf01   : > { %v1447_v62 = vadd.f32 %v1446_v61, %v1438_v55 }
 0xf03   : > { %v1448_v63 = vmul.f32 0.7978846, %v1447_v62 }
 0xf05   : > { %2084 = vtanh.f32 %v1448_v63 }
 0xf12   : > { %v2085_v9 = vpop.eup %2084 }
 0xf13   : > { %v1450_v2 = vadd.f32 1.0, %v2085_v9 }
 0xf15   : > { %v1451_v3 = vmul.f32 %v1450_v2, %v1443_v0 }
 0xf17   : > { %v1452_v4 = vpack.c.bf16 %v1451_v3, %v1451_v3 }
 0xf19   : > { %1965 = vmatmul.mubr.bf16.vlgmr.msra.gmra.mxu0 %v1452_v4 }
 0xfd9   : > { %v1558_v5 = vpop.f32.mrf.mxu0 }
 0xfda   : > { %v1559_v6 = vadd.f32 %v1804_v22, %v1558_v5 }
 0xfdb   : > { %v1966_v7 = vpop.f32.mrf.mxu0 }
 0xfdc   : > { %v1564_v8 = vadd.f32 %v1559_v6, %v2522_v26 }
 0xfdd   : > { %v1561_v10 = vpop.f32.mrf.mxu0 }
 0xfde   : > { %1565 = vst.msk [vmem:[%s2390_s16] sm:$0xff] %vm610_vm1, %v1564_v8 }
 0xfdf   : > { %v1967_v11 = vpop.f32.mrf.mxu0 }
 0xfe0   : > { %2099 = shalt.err (!%p2096_p8)
}
 0xfe1   : > { %s2100_s16 = scalar_lea.hbm %s2573_s22, 128  ;;  %s2104_s30 = scalar_lea.hbm %s2688_s19, 256 }
 0xfe2   : > { %p2101_p10 = scmp.ne.s32.totalorder %s2573_s22, %s2100_s16  ;;  %p2105_p13 = scmp.lt.s32.totalorder %s2573_s22, %s2688_s19 }
 0xfe3   : > { %p2106_p0 = scmp.lt.s32.totalorder %s2104_s30, %s2100_s16 }
 0xfe4   : > { %p2102_p11 = pnand %p2101_p10, %p2308_p3 }
 0xfe5   : > { %p2107_p1 = por %p2106_p0, %p2105_p13 }
 0xfe6   : > { %p2103_p12 = pneg %p2102_p11 }
 0xfe8   : > { %p2108_p2 = pnand %p2107_p1, %p2103_p12 }
 0xfea   : > { %2111 = shalt.err (!%p2108_p2)
}
 0xfeb   : > { %1968 = dma.vmem_to_hbm [thread:$0]  (%p2308_p3), %s2575_s4, 128, %s2573_s22, %s1567_s21  }
 0xfec PF: > { %s2690_s3 = sld [smem:[#allocation12_spill]] }
 0xfed   : > { %s2691_s17 = sld [smem:[#allocation5_spill]] }
 0xff2   : > { %p1974_p4 = scmp.ge.s32.totalorder %s2690_s3, 2 }
 0xff3   : > { %s1592_s27 = sand.u32 1, %s2691_s17  }
 0xff4   : > { %p1971_p5 = pnand %p1974_p4, %p2318_p9  ;;  %s1593_s28 = scalar_lea.sflag [#allocation3], %s1592_s27 }
 0xff6   : > { %p1972_p6 = pneg %p1971_p5 }
 0xff8   : > { %2145 = dma.done.wait (%p1972_p6), %s1593_s28, 128  }
 0xff9   : > { %2147 = vsyncadd (%p1972_p6), %s1593_s28, 4294967168  ;;  %s25_s28 = sadd.s32 1, %s2690_s3   ;;  %s2693_s21 = sld [smem:[#allocation6_spill]] }
 0xffa   : > { %p22_p7 = scmp.ge.s32.totalorder %s25_s28, 6   ;;  %s2694_s22 = sld [smem:[#allocation7_spill]] }
 0xffb   : > { %s2695_s23 = sld [smem:[#allocation17_spill]] }
 0xffc   : > { %s2696_s24 = sld [smem:[#allocation10_spill]]  ;;  %24 = sbr.rel (!%p22_p7) target bundleno = 10 (0xa), region = 143 }
 0xffd   : > { %s2697_s25 = sld [smem:[#allocation11_spill]] }
 0xffe   : > { %s2698_s26 = sld [smem:[#allocation13_spill]] }
 0xfff   : > { %s2699_s27 = sld [smem:[#allocation15_spill]] }
0x1001   :  { %1598 = vsyncpa [#allocation3], 1 }
0x1002   :  { %1600 = vsyncpa [#allocation3 + $0x1], 1 }

</bundles_post_ra>
